<compile_context>
chip_gen: v6e
topology: v6e:2x2x1
jax: 0.10.0
libtpu: 0.0.40
codegen_flags: <defaults>
</compile_context>

<pallas_src>
import math
import functools

import jax
import jax.numpy as jnp
from jax import lax
from jax.experimental import pallas as pl
from jax.experimental.pallas import tpu as pltpu

# ----------------------------- model dims (small stand-in) --------------------
B = 2              # batch
S = 8              # sequence length
H = 128            # hidden_size (stand-in for 768; keeps the lane dim dense)
NUM_HEADS = 4
HEAD_DIM = H // NUM_HEADS
INTER = 256        # FFN intermediate size
NUM_LAYERS = 2
VOCAB = 50
TYPE_VOCAB = 2
MAX_POS = 16
NUM_CLASSES = 7
C_PAD = 128        # classifier output padded to one full lane register
DR_RATE = 0.5      # dropout present in module; identity at inference (eval mode)


# ------------------------------ small helpers ---------------------------------
def _ln(x, g, b):
    # f32 layernorm (eps matches PyTorch BERT 1e-12).
    mu = jnp.mean(x, axis=-1, keepdims=True)
    var = jnp.mean((x - mu) ** 2, axis=-1, keepdims=True)
    return (x - mu) * lax.rsqrt(var + 1e-12) * g + b


# ------------------------------ fused BERT kernel ------------------------------
def _bert_kernel(h_emb_ref, bias_ref, emb_g_ref, emb_b_ref,
                 wqkv_ref, bqkv_ref, wo_ref, bo_ref, ln1_g_ref, ln1_b_ref,
                 wi_ref, bi_ref, wf_ref, bf_ref, ln2_g_ref, ln2_b_ref,
                 wp_ref, bp_ref, wc_ref, bc_ref,
                 o_ref, h_state,
                 *, num_heads, head_dim):
    layer = pl.program_id(1)
    hid = num_heads * head_dim

    # --- layer 0: embedding LayerNorm fused in (initialises the persistent h state).
    @pl.when(layer == 0)
    def _():
        h_state[...] = _ln(h_emb_ref[0], emb_g_ref[...], emb_b_ref[...])

    h = h_state[...]                                        # (S, H) f32, resident in VMEM

    # --- fused QKV projection: one (H, 3H) bf16 GEMM, f32 accumulate.
    #     1/sqrt(head_dim) is already folded into the Q columns of wqkv.
    qkv = jnp.dot(h.astype(jnp.bfloat16), wqkv_ref[0],
                  preferred_element_type=jnp.float32) + bqkv_ref[0]

    bias = bias_ref[0]                                      # (1, S) additive mask bias

    # --- multi-head self-attention for this batch element.
    # NOTE: num_heads is tiny (4) at the stand-in size; at real koBERT sizes
    # batch*heads would become a grid axis with per-(b,h) tiles from BlockSpec.
    ctx_heads = []
    for hd in range(num_heads):
        c0 = hd * head_dim
        q_h = qkv[:, c0:c0 + head_dim]                      # (S, Dh)
        k_h = qkv[:, hid + c0:hid + c0 + head_dim]
        v_h = qkv[:, 2 * hid + c0:2 * hid + c0 + head_dim]
        # contract last dims directly (no k.T transpose through the XLU)
        s = lax.dot_general(q_h, k_h, (((1,), (1,)), ((), ())),
                            preferred_element_type=jnp.float32)
        s = s + bias
        m = jnp.max(s, axis=-1, keepdims=True)
        p = jnp.exp(s - m)
        p = p * pl.reciprocal(jnp.sum(p, axis=-1, keepdims=True), approx=True)
        ctx_heads.append(jnp.dot(p, v_h, preferred_element_type=jnp.float32))

    # assemble the full (S, H) context tile -> ONE K=128 output-projection GEMM
    ctx = jnp.concatenate(ctx_heads, axis=-1)               # (S, H)
    attn = jnp.dot(ctx.astype(jnp.bfloat16), wo_ref[0],
                   preferred_element_type=jnp.float32) + bo_ref[0]

    # --- residual + LN1 (f32)
    h1 = _ln(attn + h, ln1_g_ref[0], ln1_b_ref[0])

    # --- FFN (bf16 GEMMs, f32 accumulate; GELU/bias in f32)
    f = jnp.dot(h1.astype(jnp.bfloat16), wi_ref[0],
                preferred_element_type=jnp.float32) + bi_ref[0]
    # TODO(synk): HF/koBERT BERT uses exact-erf GELU; tanh approximation keeps this on the EUP.
    f = jax.nn.gelu(f, approximate=True)
    f = jnp.dot(f.astype(jnp.bfloat16), wf_ref[0],
                preferred_element_type=jnp.float32) + bf_ref[0]

    # --- residual + LN2, carried in VMEM to the next layer step
    h2 = _ln(f + h1, ln2_g_ref[0], ln2_b_ref[0])
    h_state[...] = h2

    # --- last layer: fused pooler (tanh on [CLS]) + classifier.
    #     dropout(p=DR_RATE) after the pooler is identity at inference.
    @pl.when(layer == pl.num_programs(1) - 1)
    def _():
        pooled = jnp.tanh(
            jnp.dot(h2[0:1, :].astype(jnp.bfloat16), wp_ref[...],
                    preferred_element_type=jnp.float32) + bp_ref[...])
        logits = jnp.dot(pooled.astype(jnp.bfloat16), wc_ref[...],
                         preferred_element_type=jnp.float32) + bc_ref[...]
        o_ref[0] = logits.astype(o_ref.dtype)


# ------------------------------ kernel wrapper ----------------------------------
def pallas_bert(params, h_emb, mask_bias, *, batch):
    kernel = functools.partial(_bert_kernel, num_heads=NUM_HEADS, head_dim=HEAD_DIM)

    args = (h_emb, mask_bias, params["emb_ln_g"], params["emb_ln_b"],
            params["wqkv"], params["bqkv"], params["wo"], params["bo"],
            params["ln1_g"], params["ln1_b"], params["wi"], params["bi"],
            params["wf"], params["bf"], params["ln2_g"], params["ln2_b"],
            params["wp"], params["bp"], params["wc"], params["bc"])

    def batch_block(a):        # per-batch block, constant across the layer axis (DMA'd once / batch)
        return pl.BlockSpec((1,) + a.shape[1:], lambda b, l: (b,) + (0,) * (a.ndim - 1))

    def layer_block(a):        # per-layer weight slab -> pipeline prefetches layer l+1 during layer l
        return pl.BlockSpec((1,) + a.shape[1:], lambda b, l: (l,) + (0,) * (a.ndim - 1))

    def resident(a):           # full array, constant across the whole grid
        return pl.BlockSpec(a.shape, lambda b, l: (0,) * a.ndim)

    in_specs = [batch_block(h_emb), batch_block(mask_bias),
                resident(params["emb_ln_g"]), resident(params["emb_ln_b"])]
    for name in ("wqkv", "bqkv", "wo", "bo", "ln1_g", "ln1_b",
                 "wi", "bi", "wf", "bf", "ln2_g", "ln2_b"):
        in_specs.append(layer_block(params[name]))
    in_specs += [resident(params["wp"]), resident(params["bp"]),
                 resident(params["wc"]), resident(params["bc"])]
    # NOTE: at real BERT-base size on v7x the layer weight slabs should be single-buffered
    # (pipeline_mode=pl.Buffered(1)) to stay under the 64 MiB VMEM; defaults are fine here.

    # Advisory cost estimate so XLA schedules the embedding gathers around the long call.
    flops = 2 * batch * NUM_LAYERS * (
        S * H * 3 * H + NUM_HEADS * 2 * S * S * HEAD_DIM
        + S * H * H + 2 * S * H * INTER) + 2 * batch * (H * H + H * C_PAD)
    transcendentals = batch * NUM_LAYERS * (NUM_HEADS * S * S + S * INTER) + batch * H
    bytes_accessed = int(sum(a.size * a.dtype.itemsize for a in args) * batch
                         + h_emb.size * 4 + batch * C_PAD * 4)

    return pl.pallas_call(
        kernel,
        out_shape=jax.ShapeDtypeStruct((batch, 1, C_PAD), jnp.float32),
        grid=(batch, NUM_LAYERS),
        in_specs=in_specs,
        out_specs=pl.BlockSpec((1, 1, C_PAD), lambda b, l: (b, 0, 0)),
        scratch_shapes=[pltpu.VMEM((S, H), jnp.float32)],   # persistent hidden state across layers
        compiler_params=pltpu.CompilerParams(
            # batch axis parallel (leading, as Mosaic requires) -> 2 TCs on v7x;
            # layer axis arbitrary (sequential carry through the scratch).
            dimension_semantics=("parallel", "arbitrary"),
            vmem_limit_bytes=32 * 1024 * 1024),
        cost_estimate=pl.CostEstimate(flops=int(flops),
                                      transcendentals=int(transcendentals),
                                      bytes_accessed=int(bytes_accessed)),
    )(*args)


# ------------------------------ parameter setup --------------------------------
def init_params(key):
    def nrm(k, shape, scale=0.02):
        return (scale * jax.random.normal(k, shape)).astype(jnp.float32)

    keys = iter(jax.random.split(key, 5 + 4 * NUM_LAYERS))
    scale_q = 1.0 / math.sqrt(HEAD_DIM)

    wqkv, wo, wi, wf = [], [], [], []
    for _ in range(NUM_LAYERS):
        w = nrm(next(keys), (H, 3 * H))
        # fold 1/sqrt(head_dim) into the Q columns (Q bias is zero so no bias fold needed)
        w = w.at[:, :H].multiply(scale_q)
        wqkv.append(w)
        wo.append(nrm(next(keys), (H, H)))
        wi.append(nrm(next(keys), (H, INTER)))
        wf.append(nrm(next(keys), (INTER, H)))

    wc = nrm(next(keys), (H, NUM_CLASSES))
    params = {
        "word_emb": nrm(next(keys), (VOCAB, H)),
        "pos_emb": nrm(next(keys), (MAX_POS, H)),
        "type_emb": nrm(next(keys), (TYPE_VOCAB, H)),
        "emb_ln_g": jnp.ones((1, H), jnp.float32),
        "emb_ln_b": jnp.zeros((1, H), jnp.float32),
        # per-layer weights stacked along a leading layer axis (bf16 for the MXU; biases/LN f32)
        "wqkv": jnp.stack(wqkv).astype(jnp.bfloat16),            # (L, H, 3H)
        "bqkv": jnp.zeros((NUM_LAYERS, 1, 3 * H), jnp.float32),
        "wo": jnp.stack(wo).astype(jnp.bfloat16),                # (L, H, H)
        "bo": jnp.zeros((NUM_LAYERS, 1, H), jnp.float32),
        "ln1_g": jnp.ones((NUM_LAYERS, 1, H), jnp.float32),
        "ln1_b": jnp.zeros((NUM_LAYERS, 1, H), jnp.float32),
        "wi": jnp.stack(wi).astype(jnp.bfloat16),                # (L, H, INTER)
        "bi": jnp.zeros((NUM_LAYERS, 1, INTER), jnp.float32),
        "wf": jnp.stack(wf).astype(jnp.bfloat16),                # (L, INTER, H)
        "bf": jnp.zeros((NUM_LAYERS, 1, H), jnp.float32),
        "ln2_g": jnp.ones((NUM_LAYERS, 1, H), jnp.float32),
        "ln2_b": jnp.zeros((NUM_LAYERS, 1, H), jnp.float32),
        # pooler / classifier
        "wp": nrm(next(keys), (H, H)).astype(jnp.bfloat16),
        "bp": jnp.zeros((1, H), jnp.float32),
        "wc": jnp.pad(wc, ((0, 0), (0, C_PAD - NUM_CLASSES))).astype(jnp.bfloat16),
        "bc": jnp.zeros((1, C_PAD), jnp.float32),
    }
    return params


# ------------------------------ forward pass ------------------------------------
def bert_classifier_forward(params, token_ids, valid_length, segment_ids):
    batch, seq = token_ids.shape

    # gen_attention_mask: mask[i, :valid_length[i]] = 1 ; additive bias -10000 elsewhere.
    attention_mask = (jnp.arange(seq)[None, :] < valid_length[:, None]).astype(jnp.float32)
    mask_bias = ((1.0 - attention_mask) * -10000.0)[:, None, :]      # (B, 1, S)

    # embedding table gathers stay in XLA; the sum feeds the fused kernel (LN is inside it).
    h_emb = (params["word_emb"][token_ids]
             + params["pos_emb"][:seq][None, :, :]
             + params["type_emb"][segment_ids])                      # (B, S, H)

    logits_padded = pallas_bert(params, h_emb, mask_bias, batch=batch)   # (B, 1, C_PAD)
    return logits_padded[:, 0, :NUM_CLASSES]                             # (B, NUM_CLASSES)


# ------------------------------------ main ---------------------------------------
if __name__ == "__main__":
    key = jax.random.PRNGKey(0)
    k_params, k_tok, k_seg = jax.random.split(key, 3)

    params = init_params(k_params)
    token_ids = jax.random.randint(k_tok, (B, S), 0, VOCAB, dtype=jnp.int32)
    segment_ids = jax.random.randint(k_seg, (B, S), 0, TYPE_VOCAB, dtype=jnp.int32)
    valid_length = jnp.array([5, 8], dtype=jnp.int32)

    fwd = jax.jit(bert_classifier_forward)
    logits = fwd(params, token_ids, valid_length, segment_ids)
    jax.block_until_ready(logits)

    assert logits.shape == (B, NUM_CLASSES) and logits.dtype == jnp.float32
    print("KERNEL_OK")
</pallas_src>

<mosaic_0001>
module attributes {stable_mosaic.version = 11 : i64} {
  func.func @_bert_kernel(%arg0: i32, %arg1: i32, %arg2: memref<1x8x128xf32, #tpu.memory_space<vmem>>, %arg3: memref<1x1x8xf32, #tpu.memory_space<vmem>>, %arg4: memref<1x128xf32, #tpu.memory_space<vmem>>, %arg5: memref<1x128xf32, #tpu.memory_space<vmem>>, %arg6: memref<1x128x384xbf16, #tpu.memory_space<vmem>>, %arg7: memref<1x1x384xf32, #tpu.memory_space<vmem>>, %arg8: memref<1x128x128xbf16, #tpu.memory_space<vmem>>, %arg9: memref<1x1x128xf32, #tpu.memory_space<vmem>>, %arg10: memref<1x1x128xf32, #tpu.memory_space<vmem>>, %arg11: memref<1x1x128xf32, #tpu.memory_space<vmem>>, %arg12: memref<1x128x256xbf16, #tpu.memory_space<vmem>>, %arg13: memref<1x1x256xf32, #tpu.memory_space<vmem>>, %arg14: memref<1x256x128xbf16, #tpu.memory_space<vmem>>, %arg15: memref<1x1x128xf32, #tpu.memory_space<vmem>>, %arg16: memref<1x1x128xf32, #tpu.memory_space<vmem>>, %arg17: memref<1x1x128xf32, #tpu.memory_space<vmem>>, %arg18: memref<128x128xbf16, #tpu.memory_space<vmem>>, %arg19: memref<1x128xf32, #tpu.memory_space<vmem>>, %arg20: memref<128x128xbf16, #tpu.memory_space<vmem>>, %arg21: memref<1x128xf32, #tpu.memory_space<vmem>>, %arg22: memref<1x1x128xf32, #tpu.memory_space<vmem>>, %arg23: memref<8x128xf32, #tpu.memory_space<vmem>>) attributes {dimension_semantics = [#tpu.dimension_semantics<parallel>, #tpu.dimension_semantics<arbitrary>], iteration_bounds = array<i64: 2, 2>, scalar_prefetch = 0 : i64, scratch_operands = 1 : i64, tpu.core_type = #tpu.core_type<tc>, window_params = [{transform_indices = @transform_0, window_bounds = array<i64: 1, 8, 128>}, {transform_indices = @transform_1, window_bounds = array<i64: 1, 1, 8>}, {pipeline_mode = #tpu.pipeline_mode<synchronous>, transform_indices = @transform_2, window_bounds = array<i64: 1, 128>}, {pipeline_mode = #tpu.pipeline_mode<synchronous>, transform_indices = @transform_3, window_bounds = array<i64: 1, 128>}, {transform_indices = @transform_4, window_bounds = array<i64: 1, 128, 384>}, {transform_indices = @transform_5, window_bounds = array<i64: 1, 1, 384>}, {transform_indices = @transform_6, window_bounds = array<i64: 1, 128, 128>}, {transform_indices = @transform_7, window_bounds = array<i64: 1, 1, 128>}, {transform_indices = @transform_8, window_bounds = array<i64: 1, 1, 128>}, {transform_indices = @transform_9, window_bounds = array<i64: 1, 1, 128>}, {transform_indices = @transform_10, window_bounds = array<i64: 1, 128, 256>}, {transform_indices = @transform_11, window_bounds = array<i64: 1, 1, 256>}, {transform_indices = @transform_12, window_bounds = array<i64: 1, 256, 128>}, {transform_indices = @transform_13, window_bounds = array<i64: 1, 1, 128>}, {transform_indices = @transform_14, window_bounds = array<i64: 1, 1, 128>}, {transform_indices = @transform_15, window_bounds = array<i64: 1, 1, 128>}, {pipeline_mode = #tpu.pipeline_mode<synchronous>, transform_indices = @transform_16, window_bounds = array<i64: 128, 128>}, {pipeline_mode = #tpu.pipeline_mode<synchronous>, transform_indices = @transform_17, window_bounds = array<i64: 1, 128>}, {pipeline_mode = #tpu.pipeline_mode<synchronous>, transform_indices = @transform_18, window_bounds = array<i64: 128, 128>}, {pipeline_mode = #tpu.pipeline_mode<synchronous>, transform_indices = @transform_19, window_bounds = array<i64: 1, 128>}, {transform_indices = @transform_20, window_bounds = array<i64: 1, 1, 128>}]} {
    %c0_i32 = arith.constant 0 : i32
    %0 = arith.cmpi eq, %arg1, %c0_i32 : i32
    %1 = arith.extui %0 : i1 to i32
    %c0_i32_0 = arith.constant 0 : i32
    %2 = arith.cmpi ne, %1, %c0_i32_0 : i32
    scf.if %2 {
      %c0_77 = arith.constant 0 : index
      %c0_78 = arith.constant 0 : index
      %c0_79 = arith.constant 0 : index
      %178 = vector.load %arg2[%c0_77, %c0_78, %c0_79] : memref<1x8x128xf32, #tpu.memory_space<vmem>>, vector<1x8x128xf32>
      %179 = vector.shape_cast %178 : vector<1x8x128xf32> to vector<8x128xf32>
      %c0_80 = arith.constant 0 : index
      %c0_81 = arith.constant 0 : index
      %180 = vector.load %arg4[%c0_80, %c0_81] : memref<1x128xf32, #tpu.memory_space<vmem>>, vector<1x128xf32>
      %c0_82 = arith.constant 0 : index
      %c0_83 = arith.constant 0 : index
      %181 = vector.load %arg5[%c0_82, %c0_83] : memref<1x128xf32, #tpu.memory_space<vmem>>, vector<1x128xf32>
      %cst_84 = arith.constant dense<0.000000e+00> : vector<8xf32>
      %182 = vector.multi_reduction <add>, %179, %cst_84 [1] : vector<8x128xf32> to vector<8xf32>
      %183 = vector.shape_cast %182 : vector<8xf32> to vector<8x1xf32>
      %cst_85 = arith.constant 1.280000e+02 : f32
      %184 = vector.broadcast %cst_85 : f32 to vector<8x1xf32>
      %185 = arith.divf %183, %184 : vector<8x1xf32>
      %186 = vector.broadcast %185 : vector<8x1xf32> to vector<8x128xf32>
      %187 = arith.subf %179, %186 : vector<8x128xf32>
      %188 = arith.mulf %187, %187 : vector<8x128xf32>
      %cst_86 = arith.constant dense<0.000000e+00> : vector<8xf32>
      %189 = vector.multi_reduction <add>, %188, %cst_86 [1] : vector<8x128xf32> to vector<8xf32>
      %190 = vector.shape_cast %189 : vector<8xf32> to vector<8x1xf32>
      %cst_87 = arith.constant 1.280000e+02 : f32
      %191 = vector.broadcast %cst_87 : f32 to vector<8x1xf32>
      %192 = arith.divf %190, %191 : vector<8x1xf32>
      %193 = vector.broadcast %185 : vector<8x1xf32> to vector<8x128xf32>
      %194 = arith.subf %179, %193 : vector<8x128xf32>
      %cst_88 = arith.constant 9.99999996E-13 : f32
      %195 = vector.broadcast %cst_88 : f32 to vector<8x1xf32>
      %196 = arith.addf %192, %195 : vector<8x1xf32>
      %197 = math.rsqrt %196 : vector<8x1xf32>
      %198 = vector.broadcast %197 : vector<8x1xf32> to vector<8x128xf32>
      %199 = arith.mulf %194, %198 : vector<8x128xf32>
      %200 = vector.broadcast %180 : vector<1x128xf32> to vector<8x128xf32>
      %201 = arith.mulf %199, %200 : vector<8x128xf32>
      %202 = vector.broadcast %181 : vector<1x128xf32> to vector<8x128xf32>
      %203 = arith.addf %201, %202 : vector<8x128xf32>
      %c0_89 = arith.constant 0 : index
      %c0_90 = arith.constant 0 : index
      %204 = vector.load %arg23[%c0_89, %c0_90] : memref<8x128xf32, #tpu.memory_space<vmem>>, vector<8x128xf32>
      tpu.vector_store %arg23[%c0_89, %c0_90], %203 {strides = array<i32>} : memref<8x128xf32, #tpu.memory_space<vmem>>, vector<8x128xf32>,
    } else {
    }
    %c0 = arith.constant 0 : index
    %c0_1 = arith.constant 0 : index
    %3 = vector.load %arg23[%c0, %c0_1] : memref<8x128xf32, #tpu.memory_space<vmem>>, vector<8x128xf32>
    %4 = arith.truncf %3 : vector<8x128xf32> to vector<8x128xbf16>
    %c0_2 = arith.constant 0 : index
    %c0_3 = arith.constant 0 : index
    %c0_4 = arith.constant 0 : index
    %5 = vector.load %arg6[%c0_2, %c0_3, %c0_4] : memref<1x128x384xbf16, #tpu.memory_space<vmem>>, vector<1x128x384xbf16>
    %6 = vector.shape_cast %5 : vector<1x128x384xbf16> to vector<128x384xbf16>
    %cst = arith.constant dense<0.000000e+00> : vector<8x384xf32>
    %7 = tpu.matmul %4, %6, %cst {dimension_numbers = #tpu.dot_dimension_numbers<[1], [0], [0], [1], [0, 0, 1, 1], [], []>} : vector<8x128xbf16>, vector<128x384xbf16>, vector<8x384xf32> -> vector<8x384xf32>
    %c0_5 = arith.constant 0 : index
    %c0_6 = arith.constant 0 : index
    %c0_7 = arith.constant 0 : index
    %8 = vector.load %arg7[%c0_5, %c0_6, %c0_7] : memref<1x1x384xf32, #tpu.memory_space<vmem>>, vector<1x1x384xf32>
    %9 = vector.shape_cast %8 : vector<1x1x384xf32> to vector<1x384xf32>
    %10 = vector.broadcast %9 : vector<1x384xf32> to vector<8x384xf32>
    %11 = arith.addf %7, %10 : vector<8x384xf32>
    %c0_8 = arith.constant 0 : index
    %c0_9 = arith.constant 0 : index
    %c0_10 = arith.constant 0 : index
    %12 = vector.load %arg3[%c0_8, %c0_9, %c0_10] : memref<1x1x8xf32, #tpu.memory_space<vmem>>, vector<1x1x8xf32>
    %13 = vector.shape_cast %12 : vector<1x1x8xf32> to vector<1x8xf32>
    %14 = vector.extract_strided_slice %11 {offsets = [0, 0], sizes = [8, 32], strides = [1, 1]} : vector<8x384xf32> to vector<8x32xf32>
    %15 = vector.extract_strided_slice %11 {offsets = [0, 128], sizes = [8, 32], strides = [1, 1]} : vector<8x384xf32> to vector<8x32xf32>
    %16 = vector.extract_strided_slice %11 {offsets = [0, 256], sizes = [8, 32], strides = [1, 1]} : vector<8x384xf32> to vector<8x32xf32>
    %cst_11 = arith.constant dense<0.000000e+00> : vector<8x8xf32>
    %17 = tpu.matmul %14, %15, %cst_11 {dimension_numbers = #tpu.dot_dimension_numbers<[1], [1], [0], [0], [0, 0, 1, 0], [], []>} : vector<8x32xf32>, vector<8x32xf32>, vector<8x8xf32> -> vector<8x8xf32>
    %18 = vector.broadcast %13 : vector<1x8xf32> to vector<8x8xf32>
    %19 = arith.addf %17, %18 : vector<8x8xf32>
    %cst_12 = arith.constant dense<0xFF800000> : vector<8xf32>
    %20 = vector.multi_reduction <maximumf>, %19, %cst_12 [1] : vector<8x8xf32> to vector<8xf32>
    %21 = vector.shape_cast %20 : vector<8xf32> to vector<8x1xf32>
    %22 = vector.broadcast %21 : vector<8x1xf32> to vector<8x8xf32>
    %23 = arith.subf %19, %22 : vector<8x8xf32>
    %24 = math.exp %23 : vector<8x8xf32>
    %cst_13 = arith.constant dense<0.000000e+00> : vector<8xf32>
    %25 = vector.multi_reduction <add>, %24, %cst_13 [1] : vector<8x8xf32> to vector<8xf32>
    %26 = vector.shape_cast %25 : vector<8xf32> to vector<8x1xf32>
    %27 = tpu.reciprocal %26 {approx = true} : vector<8x1xf32> -> vector<8x1xf32>
    %28 = vector.broadcast %27 : vector<8x1xf32> to vector<8x8xf32>
    %29 = arith.mulf %24, %28 : vector<8x8xf32>
    %cst_14 = arith.constant dense<0.000000e+00> : vector<8x32xf32>
    %30 = tpu.matmul %29, %16, %cst_14 {dimension_numbers = #tpu.dot_dimension_numbers<[1], [0], [0], [1], [0, 0, 1, 1], [], []>} : vector<8x8xf32>, vector<8x32xf32>, vector<8x32xf32> -> vector<8x32xf32>
    %31 = vector.extract_strided_slice %11 {offsets = [0, 32], sizes = [8, 32], strides = [1, 1]} : vector<8x384xf32> to vector<8x32xf32>
    %32 = vector.extract_strided_slice %11 {offsets = [0, 160], sizes = [8, 32], strides = [1, 1]} : vector<8x384xf32> to vector<8x32xf32>
    %33 = vector.extract_strided_slice %11 {offsets = [0, 288], sizes = [8, 32], strides = [1, 1]} : vector<8x384xf32> to vector<8x32xf32>
    %cst_15 = arith.constant dense<0.000000e+00> : vector<8x8xf32>
    %34 = tpu.matmul %31, %32, %cst_15 {dimension_numbers = #tpu.dot_dimension_numbers<[1], [1], [0], [0], [0, 0, 1, 0], [], []>} : vector<8x32xf32>, vector<8x32xf32>, vector<8x8xf32> -> vector<8x8xf32>
    %35 = vector.broadcast %13 : vector<1x8xf32> to vector<8x8xf32>
    %36 = arith.addf %34, %35 : vector<8x8xf32>
    %cst_16 = arith.constant dense<0xFF800000> : vector<8xf32>
    %37 = vector.multi_reduction <maximumf>, %36, %cst_16 [1] : vector<8x8xf32> to vector<8xf32>
    %38 = vector.shape_cast %37 : vector<8xf32> to vector<8x1xf32>
    %39 = vector.broadcast %38 : vector<8x1xf32> to vector<8x8xf32>
    %40 = arith.subf %36, %39 : vector<8x8xf32>
    %41 = math.exp %40 : vector<8x8xf32>
    %cst_17 = arith.constant dense<0.000000e+00> : vector<8xf32>
    %42 = vector.multi_reduction <add>, %41, %cst_17 [1] : vector<8x8xf32> to vector<8xf32>
    %43 = vector.shape_cast %42 : vector<8xf32> to vector<8x1xf32>
    %44 = tpu.reciprocal %43 {approx = true} : vector<8x1xf32> -> vector<8x1xf32>
    %45 = vector.broadcast %44 : vector<8x1xf32> to vector<8x8xf32>
    %46 = arith.mulf %41, %45 : vector<8x8xf32>
    %cst_18 = arith.constant dense<0.000000e+00> : vector<8x32xf32>
    %47 = tpu.matmul %46, %33, %cst_18 {dimension_numbers = #tpu.dot_dimension_numbers<[1], [0], [0], [1], [0, 0, 1, 1], [], []>} : vector<8x8xf32>, vector<8x32xf32>, vector<8x32xf32> -> vector<8x32xf32>
    %48 = vector.extract_strided_slice %11 {offsets = [0, 64], sizes = [8, 32], strides = [1, 1]} : vector<8x384xf32> to vector<8x32xf32>
    %49 = vector.extract_strided_slice %11 {offsets = [0, 192], sizes = [8, 32], strides = [1, 1]} : vector<8x384xf32> to vector<8x32xf32>
    %50 = vector.extract_strided_slice %11 {offsets = [0, 320], sizes = [8, 32], strides = [1, 1]} : vector<8x384xf32> to vector<8x32xf32>
    %cst_19 = arith.constant dense<0.000000e+00> : vector<8x8xf32>
    %51 = tpu.matmul %48, %49, %cst_19 {dimension_numbers = #tpu.dot_dimension_numbers<[1], [1], [0], [0], [0, 0, 1, 0], [], []>} : vector<8x32xf32>, vector<8x32xf32>, vector<8x8xf32> -> vector<8x8xf32>
    %52 = vector.broadcast %13 : vector<1x8xf32> to vector<8x8xf32>
    %53 = arith.addf %51, %52 : vector<8x8xf32>
    %cst_20 = arith.constant dense<0xFF800000> : vector<8xf32>
    %54 = vector.multi_reduction <maximumf>, %53, %cst_20 [1] : vector<8x8xf32> to vector<8xf32>
    %55 = vector.shape_cast %54 : vector<8xf32> to vector<8x1xf32>
    %56 = vector.broadcast %55 : vector<8x1xf32> to vector<8x8xf32>
    %57 = arith.subf %53, %56 : vector<8x8xf32>
    %58 = math.exp %57 : vector<8x8xf32>
    %cst_21 = arith.constant dense<0.000000e+00> : vector<8xf32>
    %59 = vector.multi_reduction <add>, %58, %cst_21 [1] : vector<8x8xf32> to vector<8xf32>
    %60 = vector.shape_cast %59 : vector<8xf32> to vector<8x1xf32>
    %61 = tpu.reciprocal %60 {approx = true} : vector<8x1xf32> -> vector<8x1xf32>
    %62 = vector.broadcast %61 : vector<8x1xf32> to vector<8x8xf32>
    %63 = arith.mulf %58, %62 : vector<8x8xf32>
    %cst_22 = arith.constant dense<0.000000e+00> : vector<8x32xf32>
    %64 = tpu.matmul %63, %50, %cst_22 {dimension_numbers = #tpu.dot_dimension_numbers<[1], [0], [0], [1], [0, 0, 1, 1], [], []>} : vector<8x8xf32>, vector<8x32xf32>, vector<8x32xf32> -> vector<8x32xf32>
    %65 = vector.extract_strided_slice %11 {offsets = [0, 96], sizes = [8, 32], strides = [1, 1]} : vector<8x384xf32> to vector<8x32xf32>
    %66 = vector.extract_strided_slice %11 {offsets = [0, 224], sizes = [8, 32], strides = [1, 1]} : vector<8x384xf32> to vector<8x32xf32>
    %67 = vector.extract_strided_slice %11 {offsets = [0, 352], sizes = [8, 32], strides = [1, 1]} : vector<8x384xf32> to vector<8x32xf32>
    %cst_23 = arith.constant dense<0.000000e+00> : vector<8x8xf32>
    %68 = tpu.matmul %65, %66, %cst_23 {dimension_numbers = #tpu.dot_dimension_numbers<[1], [1], [0], [0], [0, 0, 1, 0], [], []>} : vector<8x32xf32>, vector<8x32xf32>, vector<8x8xf32> -> vector<8x8xf32>
    %69 = vector.broadcast %13 : vector<1x8xf32> to vector<8x8xf32>
    %70 = arith.addf %68, %69 : vector<8x8xf32>
    %cst_24 = arith.constant dense<0xFF800000> : vector<8xf32>
    %71 = vector.multi_reduction <maximumf>, %70, %cst_24 [1] : vector<8x8xf32> to vector<8xf32>
    %72 = vector.shape_cast %71 : vector<8xf32> to vector<8x1xf32>
    %73 = vector.broadcast %72 : vector<8x1xf32> to vector<8x8xf32>
    %74 = arith.subf %70, %73 : vector<8x8xf32>
    %75 = math.exp %74 : vector<8x8xf32>
    %cst_25 = arith.constant dense<0.000000e+00> : vector<8xf32>
    %76 = vector.multi_reduction <add>, %75, %cst_25 [1] : vector<8x8xf32> to vector<8xf32>
    %77 = vector.shape_cast %76 : vector<8xf32> to vector<8x1xf32>
    %78 = tpu.reciprocal %77 {approx = true} : vector<8x1xf32> -> vector<8x1xf32>
    %79 = vector.broadcast %78 : vector<8x1xf32> to vector<8x8xf32>
    %80 = arith.mulf %75, %79 : vector<8x8xf32>
    %cst_26 = arith.constant dense<0.000000e+00> : vector<8x32xf32>
    %81 = tpu.matmul %80, %67, %cst_26 {dimension_numbers = #tpu.dot_dimension_numbers<[1], [0], [0], [1], [0, 0, 1, 1], [], []>} : vector<8x8xf32>, vector<8x32xf32>, vector<8x32xf32> -> vector<8x32xf32>
    %82 = tpu.concatenate %30, %47, %64, %81 in 1 : vector<8x32xf32>, vector<8x32xf32>, vector<8x32xf32>, vector<8x32xf32> -> vector<8x128xf32>
    %83 = arith.truncf %82 : vector<8x128xf32> to vector<8x128xbf16>
    %c0_27 = arith.constant 0 : index
    %c0_28 = arith.constant 0 : index
    %c0_29 = arith.constant 0 : index
    %84 = vector.load %arg8[%c0_27, %c0_28, %c0_29] : memref<1x128x128xbf16, #tpu.memory_space<vmem>>, vector<1x128x128xbf16>
    %85 = vector.shape_cast %84 : vector<1x128x128xbf16> to vector<128x128xbf16>
    %cst_30 = arith.constant dense<0.000000e+00> : vector<8x128xf32>
    %86 = tpu.matmul %83, %85, %cst_30 {dimension_numbers = #tpu.dot_dimension_numbers<[1], [0], [0], [1], [0, 0, 1, 1], [], []>} : vector<8x128xbf16>, vector<128x128xbf16>, vector<8x128xf32> -> vector<8x128xf32>
    %c0_31 = arith.constant 0 : index
    %c0_32 = arith.constant 0 : index
    %c0_33 = arith.constant 0 : index
    %87 = vector.load %arg9[%c0_31, %c0_32, %c0_33] : memref<1x1x128xf32, #tpu.memory_space<vmem>>, vector<1x1x128xf32>
    %88 = vector.shape_cast %87 : vector<1x1x128xf32> to vector<1x128xf32>
    %89 = vector.broadcast %88 : vector<1x128xf32> to vector<8x128xf32>
    %90 = arith.addf %86, %89 : vector<8x128xf32>
    %91 = arith.addf %90, %3 : vector<8x128xf32>
    %c0_34 = arith.constant 0 : index
    %c0_35 = arith.constant 0 : index
    %c0_36 = arith.constant 0 : index
    %92 = vector.load %arg10[%c0_34, %c0_35, %c0_36] : memref<1x1x128xf32, #tpu.memory_space<vmem>>, vector<1x1x128xf32>
    %93 = vector.shape_cast %92 : vector<1x1x128xf32> to vector<1x128xf32>
    %c0_37 = arith.constant 0 : index
    %c0_38 = arith.constant 0 : index
    %c0_39 = arith.constant 0 : index
    %94 = vector.load %arg11[%c0_37, %c0_38, %c0_39] : memref<1x1x128xf32, #tpu.memory_space<vmem>>, vector<1x1x128xf32>
    %95 = vector.shape_cast %94 : vector<1x1x128xf32> to vector<1x128xf32>
    %cst_40 = arith.constant dense<0.000000e+00> : vector<8xf32>
    %96 = vector.multi_reduction <add>, %91, %cst_40 [1] : vector<8x128xf32> to vector<8xf32>
    %97 = vector.shape_cast %96 : vector<8xf32> to vector<8x1xf32>
    %cst_41 = arith.constant 1.280000e+02 : f32
    %98 = vector.broadcast %cst_41 : f32 to vector<8x1xf32>
    %99 = arith.divf %97, %98 : vector<8x1xf32>
    %100 = vector.broadcast %99 : vector<8x1xf32> to vector<8x128xf32>
    %101 = arith.subf %91, %100 : vector<8x128xf32>
    %102 = arith.mulf %101, %101 : vector<8x128xf32>
    %cst_42 = arith.constant dense<0.000000e+00> : vector<8xf32>
    %103 = vector.multi_reduction <add>, %102, %cst_42 [1] : vector<8x128xf32> to vector<8xf32>
    %104 = vector.shape_cast %103 : vector<8xf32> to vector<8x1xf32>
    %cst_43 = arith.constant 1.280000e+02 : f32
    %105 = vector.broadcast %cst_43 : f32 to vector<8x1xf32>
    %106 = arith.divf %104, %105 : vector<8x1xf32>
    %107 = vector.broadcast %99 : vector<8x1xf32> to vector<8x128xf32>
    %108 = arith.subf %91, %107 : vector<8x128xf32>
    %cst_44 = arith.constant 9.99999996E-13 : f32
    %109 = vector.broadcast %cst_44 : f32 to vector<8x1xf32>
    %110 = arith.addf %106, %109 : vector<8x1xf32>
    %111 = math.rsqrt %110 : vector<8x1xf32>
    %112 = vector.broadcast %111 : vector<8x1xf32> to vector<8x128xf32>
    %113 = arith.mulf %108, %112 : vector<8x128xf32>
    %114 = vector.broadcast %93 : vector<1x128xf32> to vector<8x128xf32>
    %115 = arith.mulf %113, %114 : vector<8x128xf32>
    %116 = vector.broadcast %95 : vector<1x128xf32> to vector<8x128xf32>
    %117 = arith.addf %115, %116 : vector<8x128xf32>
    %118 = arith.truncf %117 : vector<8x128xf32> to vector<8x128xbf16>
    %c0_45 = arith.constant 0 : index
    %c0_46 = arith.constant 0 : index
    %c0_47 = arith.constant 0 : index
    %119 = vector.load %arg12[%c0_45, %c0_46, %c0_47] : memref<1x128x256xbf16, #tpu.memory_space<vmem>>, vector<1x128x256xbf16>
    %120 = vector.shape_cast %119 : vector<1x128x256xbf16> to vector<128x256xbf16>
    %cst_48 = arith.constant dense<0.000000e+00> : vector<8x256xf32>
    %121 = tpu.matmul %118, %120, %cst_48 {dimension_numbers = #tpu.dot_dimension_numbers<[1], [0], [0], [1], [0, 0, 1, 1], [], []>} : vector<8x128xbf16>, vector<128x256xbf16>, vector<8x256xf32> -> vector<8x256xf32>
    %c0_49 = arith.constant 0 : index
    %c0_50 = arith.constant 0 : index
    %c0_51 = arith.constant 0 : index
    %122 = vector.load %arg13[%c0_49, %c0_50, %c0_51] : memref<1x1x256xf32, #tpu.memory_space<vmem>>, vector<1x1x256xf32>
    %123 = vector.shape_cast %122 : vector<1x1x256xf32> to vector<1x256xf32>
    %124 = vector.broadcast %123 : vector<1x256xf32> to vector<8x256xf32>
    %125 = arith.addf %121, %124 : vector<8x256xf32>
    %126 = arith.mulf %125, %125 : vector<8x256xf32>
    %127 = arith.mulf %125, %126 : vector<8x256xf32>
    %cst_52 = arith.constant 4.471500e-02 : f32
    %128 = vector.broadcast %cst_52 : f32 to vector<8x256xf32>
    %129 = arith.mulf %128, %127 : vector<8x256xf32>
    %130 = arith.addf %125, %129 : vector<8x256xf32>
    %cst_53 = arith.constant 0.797884583 : f32
    %131 = vector.broadcast %cst_53 : f32 to vector<8x256xf32>
    %132 = arith.mulf %131, %130 : vector<8x256xf32>
    %133 = math.tanh %132 : vector<8x256xf32>
    %cst_54 = arith.constant 1.000000e+00 : f32
    %134 = vector.broadcast %cst_54 : f32 to vector<8x256xf32>
    %135 = arith.addf %134, %133 : vector<8x256xf32>
    %cst_55 = arith.constant 5.000000e-01 : f32
    %136 = vector.broadcast %cst_55 : f32 to vector<8x256xf32>
    %137 = arith.mulf %136, %135 : vector<8x256xf32>
    %138 = arith.mulf %125, %137 : vector<8x256xf32>
    %139 = arith.truncf %138 : vector<8x256xf32> to vector<8x256xbf16>
    %c0_56 = arith.constant 0 : index
    %c0_57 = arith.constant 0 : index
    %c0_58 = arith.constant 0 : index
    %140 = vector.load %arg14[%c0_56, %c0_57, %c0_58] : memref<1x256x128xbf16, #tpu.memory_space<vmem>>, vector<1x256x128xbf16>
    %141 = vector.shape_cast %140 : vector<1x256x128xbf16> to vector<256x128xbf16>
    %cst_59 = arith.constant dense<0.000000e+00> : vector<8x128xf32>
    %142 = tpu.matmul %139, %141, %cst_59 {dimension_numbers = #tpu.dot_dimension_numbers<[1], [0], [0], [1], [0, 0, 1, 1], [], []>} : vector<8x256xbf16>, vector<256x128xbf16>, vector<8x128xf32> -> vector<8x128xf32>
    %c0_60 = arith.constant 0 : index
    %c0_61 = arith.constant 0 : index
    %c0_62 = arith.constant 0 : index
    %143 = vector.load %arg15[%c0_60, %c0_61, %c0_62] : memref<1x1x128xf32, #tpu.memory_space<vmem>>, vector<1x1x128xf32>
    %144 = vector.shape_cast %143 : vector<1x1x128xf32> to vector<1x128xf32>
    %145 = vector.broadcast %144 : vector<1x128xf32> to vector<8x128xf32>
    %146 = arith.addf %142, %145 : vector<8x128xf32>
    %147 = arith.addf %146, %117 : vector<8x128xf32>
    %c0_63 = arith.constant 0 : index
    %c0_64 = arith.constant 0 : index
    %c0_65 = arith.constant 0 : index
    %148 = vector.load %arg16[%c0_63, %c0_64, %c0_65] : memref<1x1x128xf32, #tpu.memory_space<vmem>>, vector<1x1x128xf32>
    %149 = vector.shape_cast %148 : vector<1x1x128xf32> to vector<1x128xf32>
    %c0_66 = arith.constant 0 : index
    %c0_67 = arith.constant 0 : index
    %c0_68 = arith.constant 0 : index
    %150 = vector.load %arg17[%c0_66, %c0_67, %c0_68] : memref<1x1x128xf32, #tpu.memory_space<vmem>>, vector<1x1x128xf32>
    %151 = vector.shape_cast %150 : vector<1x1x128xf32> to vector<1x128xf32>
    %cst_69 = arith.constant dense<0.000000e+00> : vector<8xf32>
    %152 = vector.multi_reduction <add>, %147, %cst_69 [1] : vector<8x128xf32> to vector<8xf32>
    %153 = vector.shape_cast %152 : vector<8xf32> to vector<8x1xf32>
    %cst_70 = arith.constant 1.280000e+02 : f32
    %154 = vector.broadcast %cst_70 : f32 to vector<8x1xf32>
    %155 = arith.divf %153, %154 : vector<8x1xf32>
    %156 = vector.broadcast %155 : vector<8x1xf32> to vector<8x128xf32>
    %157 = arith.subf %147, %156 : vector<8x128xf32>
    %158 = arith.mulf %157, %157 : vector<8x128xf32>
    %cst_71 = arith.constant dense<0.000000e+00> : vector<8xf32>
    %159 = vector.multi_reduction <add>, %158, %cst_71 [1] : vector<8x128xf32> to vector<8xf32>
    %160 = vector.shape_cast %159 : vector<8xf32> to vector<8x1xf32>
    %cst_72 = arith.constant 1.280000e+02 : f32
    %161 = vector.broadcast %cst_72 : f32 to vector<8x1xf32>
    %162 = arith.divf %160, %161 : vector<8x1xf32>
    %163 = vector.broadcast %155 : vector<8x1xf32> to vector<8x128xf32>
    %164 = arith.subf %147, %163 : vector<8x128xf32>
    %cst_73 = arith.constant 9.99999996E-13 : f32
    %165 = vector.broadcast %cst_73 : f32 to vector<8x1xf32>
    %166 = arith.addf %162, %165 : vector<8x1xf32>
    %167 = math.rsqrt %166 : vector<8x1xf32>
    %168 = vector.broadcast %167 : vector<8x1xf32> to vector<8x128xf32>
    %169 = arith.mulf %164, %168 : vector<8x128xf32>
    %170 = vector.broadcast %149 : vector<1x128xf32> to vector<8x128xf32>
    %171 = arith.mulf %169, %170 : vector<8x128xf32>
    %172 = vector.broadcast %151 : vector<1x128xf32> to vector<8x128xf32>
    %173 = arith.addf %171, %172 : vector<8x128xf32>
    %c0_74 = arith.constant 0 : index
    %c0_75 = arith.constant 0 : index
    %174 = vector.load %arg23[%c0_74, %c0_75] : memref<8x128xf32, #tpu.memory_space<vmem>>, vector<8x128xf32>
    tpu.vector_store %arg23[%c0_74, %c0_75], %173 {strides = array<i32>} : memref<8x128xf32, #tpu.memory_space<vmem>>, vector<8x128xf32>,
    %c1_i32 = arith.constant 1 : i32
    %175 = arith.cmpi eq, %arg1, %c1_i32 : i32
    %176 = arith.extui %175 : i1 to i32
    %c0_i32_76 = arith.constant 0 : i32
    %177 = arith.cmpi ne, %176, %c0_i32_76 : i32
    scf.if %177 {
      %178 = vector.extract_strided_slice %173 {offsets = [0, 0], sizes = [1, 128], strides = [1, 1]} : vector<8x128xf32> to vector<1x128xf32>
      %179 = arith.truncf %178 : vector<1x128xf32> to vector<1x128xbf16>
      %c0_77 = arith.constant 0 : index
      %c0_78 = arith.constant 0 : index
      %180 = vector.load %arg18[%c0_77, %c0_78] : memref<128x128xbf16, #tpu.memory_space<vmem>>, vector<128x128xbf16>
      %cst_79 = arith.constant dense<0.000000e+00> : vector<1x128xf32>
      %181 = tpu.matmul %179, %180, %cst_79 {dimension_numbers = #tpu.dot_dimension_numbers<[1], [0], [0], [1], [0, 0, 1, 1], [], []>} : vector<1x128xbf16>, vector<128x128xbf16>, vector<1x128xf32> -> vector<1x128xf32>
      %c0_80 = arith.constant 0 : index
      %c0_81 = arith.constant 0 : index
      %182 = vector.load %arg19[%c0_80, %c0_81] : memref<1x128xf32, #tpu.memory_space<vmem>>, vector<1x128xf32>
      %183 = arith.addf %181, %182 : vector<1x128xf32>
      %184 = math.tanh %183 : vector<1x128xf32>
      %185 = arith.truncf %184 : vector<1x128xf32> to vector<1x128xbf16>
      %c0_82 = arith.constant 0 : index
      %c0_83 = arith.constant 0 : index
      %186 = vector.load %arg20[%c0_82, %c0_83] : memref<128x128xbf16, #tpu.memory_space<vmem>>, vector<128x128xbf16>
      %cst_84 = arith.constant dense<0.000000e+00> : vector<1x128xf32>
      %187 = tpu.matmul %185, %186, %cst_84 {dimension_numbers = #tpu.dot_dimension_numbers<[1], [0], [0], [1], [0, 0, 1, 1], [], []>} : vector<1x128xbf16>, vector<128x128xbf16>, vector<1x128xf32> -> vector<1x128xf32>
      %c0_85 = arith.constant 0 : index
      %c0_86 = arith.constant 0 : index
      %188 = vector.load %arg21[%c0_85, %c0_86] : memref<1x128xf32, #tpu.memory_space<vmem>>, vector<1x128xf32>
      %189 = arith.addf %187, %188 : vector<1x128xf32>
      %c0_87 = arith.constant 0 : index
      %c0_88 = arith.constant 0 : index
      %c0_89 = arith.constant 0 : index
      %190 = vector.load %arg22[%c0_87, %c0_88, %c0_89] : memref<1x1x128xf32, #tpu.memory_space<vmem>>, vector<1x1x128xf32>
      %191 = vector.shape_cast %190 : vector<1x1x128xf32> to vector<1x128xf32>
      %192 = vector.shape_cast %189 : vector<1x128xf32> to vector<1x1x128xf32>
      tpu.vector_store %arg22[%c0_87, %c0_88, %c0_89], %192 {strides = array<i32>} : memref<1x1x128xf32, #tpu.memory_space<vmem>>, vector<1x1x128xf32>,
    } else {
    }
    return
  }
  func.func @transform_0(%arg0: i32, %arg1: i32) -> (i32, i32, i32) {
    %c0_i32 = arith.constant 0 : i32
    %c0_i32_0 = arith.constant 0 : i32
    %c0_i32_1 = arith.constant 0 : i32
    return %arg0, %c0_i32, %c0_i32_0 : i32, i32, i32
  }
  func.func @transform_1(%arg0: i32, %arg1: i32) -> (i32, i32, i32) {
    %c0_i32 = arith.constant 0 : i32
    %c0_i32_0 = arith.constant 0 : i32
    %c0_i32_1 = arith.constant 0 : i32
    return %arg0, %c0_i32, %c0_i32_0 : i32, i32, i32
  }
  func.func @transform_2(%arg0: i32, %arg1: i32) -> (i32, i32) {
    %c0_i32 = arith.constant 0 : i32
    %c0_i32_0 = arith.constant 0 : i32
    %c0_i32_1 = arith.constant 0 : i32
    return %c0_i32, %c0_i32_0 : i32, i32
  }
  func.func @transform_3(%arg0: i32, %arg1: i32) -> (i32, i32) {
    %c0_i32 = arith.constant 0 : i32
    %c0_i32_0 = arith.constant 0 : i32
    %c0_i32_1 = arith.constant 0 : i32
    return %c0_i32, %c0_i32_0 : i32, i32
  }
  func.func @transform_4(%arg0: i32, %arg1: i32) -> (i32, i32, i32) {
    %c0_i32 = arith.constant 0 : i32
    %c0_i32_0 = arith.constant 0 : i32
    %c0_i32_1 = arith.constant 0 : i32
    return %arg1, %c0_i32, %c0_i32_0 : i32, i32, i32
  }
  func.func @transform_5(%arg0: i32, %arg1: i32) -> (i32, i32, i32) {
    %c0_i32 = arith.constant 0 : i32
    %c0_i32_0 = arith.constant 0 : i32
    %c0_i32_1 = arith.constant 0 : i32
    return %arg1, %c0_i32, %c0_i32_0 : i32, i32, i32
  }
  func.func @transform_6(%arg0: i32, %arg1: i32) -> (i32, i32, i32) {
    %c0_i32 = arith.constant 0 : i32
    %c0_i32_0 = arith.constant 0 : i32
    %c0_i32_1 = arith.constant 0 : i32
    return %arg1, %c0_i32, %c0_i32_0 : i32, i32, i32
  }
  func.func @transform_7(%arg0: i32, %arg1: i32) -> (i32, i32, i32) {
    %c0_i32 = arith.constant 0 : i32
    %c0_i32_0 = arith.constant 0 : i32
    %c0_i32_1 = arith.constant 0 : i32
    return %arg1, %c0_i32, %c0_i32_0 : i32, i32, i32
  }
  func.func @transform_8(%arg0: i32, %arg1: i32) -> (i32, i32, i32) {
    %c0_i32 = arith.constant 0 : i32
    %c0_i32_0 = arith.constant 0 : i32
    %c0_i32_1 = arith.constant 0 : i32
    return %arg1, %c0_i32, %c0_i32_0 : i32, i32, i32
  }
  func.func @transform_9(%arg0: i32, %arg1: i32) -> (i32, i32, i32) {
    %c0_i32 = arith.constant 0 : i32
    %c0_i32_0 = arith.constant 0 : i32
    %c0_i32_1 = arith.constant 0 : i32
    return %arg1, %c0_i32, %c0_i32_0 : i32, i32, i32
  }
  func.func @transform_10(%arg0: i32, %arg1: i32) -> (i32, i32, i32) {
    %c0_i32 = arith.constant 0 : i32
    %c0_i32_0 = arith.constant 0 : i32
    %c0_i32_1 = arith.constant 0 : i32
    return %arg1, %c0_i32, %c0_i32_0 : i32, i32, i32
  }
  func.func @transform_11(%arg0: i32, %arg1: i32) -> (i32, i32, i32) {
    %c0_i32 = arith.constant 0 : i32
    %c0_i32_0 = arith.constant 0 : i32
    %c0_i32_1 = arith.constant 0 : i32
    return %arg1, %c0_i32, %c0_i32_0 : i32, i32, i32
  }
  func.func @transform_12(%arg0: i32, %arg1: i32) -> (i32, i32, i32) {
    %c0_i32 = arith.constant 0 : i32
    %c0_i32_0 = arith.constant 0 : i32
    %c0_i32_1 = arith.constant 0 : i32
    return %arg1, %c0_i32, %c0_i32_0 : i32, i32, i32
  }
  func.func @transform_13(%arg0: i32, %arg1: i32) -> (i32, i32, i32) {
    %c0_i32 = arith.constant 0 : i32
    %c0_i32_0 = arith.constant 0 : i32
    %c0_i32_1 = arith.constant 0 : i32
    return %arg1, %c0_i32, %c0_i32_0 : i32, i32, i32
  }
  func.func @transform_14(%arg0: i32, %arg1: i32) -> (i32, i32, i32) {
    %c0_i32 = arith.constant 0 : i32
    %c0_i32_0 = arith.constant 0 : i32
    %c0_i32_1 = arith.constant 0 : i32
    return %arg1, %c0_i32, %c0_i32_0 : i32, i32, i32
  }
  func.func @transform_15(%arg0: i32, %arg1: i32) -> (i32, i32, i32) {
    %c0_i32 = arith.constant 0 : i32
    %c0_i32_0 = arith.constant 0 : i32
    %c0_i32_1 = arith.constant 0 : i32
    return %arg1, %c0_i32, %c0_i32_0 : i32, i32, i32
  }
  func.func @transform_16(%arg0: i32, %arg1: i32) -> (i32, i32) {
    %c0_i32 = arith.constant 0 : i32
    %c0_i32_0 = arith.constant 0 : i32
    %c0_i32_1 = arith.constant 0 : i32
    return %c0_i32, %c0_i32_0 : i32, i32
  }
  func.func @transform_17(%arg0: i32, %arg1: i32) -> (i32, i32) {
    %c0_i32 = arith.constant 0 : i32
    %c0_i32_0 = arith.constant 0 : i32
    %c0_i32_1 = arith.constant 0 : i32
    return %c0_i32, %c0_i32_0 : i32, i32
  }
  func.func @transform_18(%arg0: i32, %arg1: i32) -> (i32, i32) {
    %c0_i32 = arith.constant 0 : i32
    %c0_i32_0 = arith.constant 0 : i32
    %c0_i32_1 = arith.constant 0 : i32
    return %c0_i32, %c0_i32_0 : i32, i32
  }
  func.func @transform_19(%arg0: i32, %arg1: i32) -> (i32, i32) {
    %c0_i32 = arith.constant 0 : i32
    %c0_i32_0 = arith.constant 0 : i32
    %c0_i32_1 = arith.constant 0 : i32
    return %c0_i32, %c0_i32_0 : i32, i32
  }
  func.func @transform_20(%arg0: i32, %arg1: i32) -> (i32, i32, i32) {
    %c0_i32 = arith.constant 0 : i32
    %c0_i32_0 = arith.constant 0 : i32
    %c0_i32_1 = arith.constant 0 : i32
    return %arg0, %c0_i32, %c0_i32_0 : i32, i32, i32
  }
}

</mosaic_0001>

<bundles_post_ra>
// kernel: bert_classifier_forward.1
= control target key start
LH: loop header
LB: loop body
LE: loop exit
PB: predicated region body
PF: predicated region fallthrough
CT: control target
= control target key end

     0   :  { %s4365_s0 = inlined_call_operand.vmem [shape: f32[2,8,128], index: 0, kind: input, shape index: {}]   ;;  %s4366_s1 = inlined_call_operand.vmem [shape: f32[2,1,8], index: 1, kind: input, shape index: {}]   ;;  %s4367_s2 = inlined_call_operand.vmem [shape: f32[1,128], index: 2, kind: input, shape index: {}]   ;;  %s4368_s3 = inlined_call_operand.vmem [shape: f32[1,128], index: 3, kind: input, shape index: {}]   ;;  %s4369_s4 = inlined_call_operand.hbm [shape: bf16[2,128,384], index: 4, kind: input, shape index: {}]   ;;  %s4370_s5 = inlined_call_operand.vmem [shape: f32[2,1,384], index: 5, kind: input, shape index: {}]   ;;  %s4371_s6 = inlined_call_operand.vmem [shape: bf16[2,128,128], index: 6, kind: input, shape index: {}]   ;;  %s4372_s7 = inlined_call_operand.vmem [shape: f32[2,1,128], index: 7, kind: input, shape index: {}]   ;;  %s4373_s8 = inlined_call_operand.vmem [shape: f32[2,1,128], index: 8, kind: input, shape index: {}]   ;;  %s4374_s9 = inlined_call_operand.vmem [shape: f32[2,1,128], index: 9, kind: input, shape index: {}]   ;;  %s4375_s10 = inlined_call_operand.hbm [shape: bf16[2,128,256], index: 10, kind: input, shape index: {}]   ;;  %s4376_s11 = inlined_call_operand.vmem [shape: f32[2,1,256], index: 11, kind: input, shape index: {}]   ;;  %s4377_s12 = inlined_call_operand.hbm [shape: bf16[2,256,128], index: 12, kind: input, shape index: {}]   ;;  %s4378_s13 = inlined_call_operand.vmem [shape: f32[2,1,128], index: 13, kind: input, shape index: {}]   ;;  %s4379_s14 = inlined_call_operand.vmem [shape: f32[2,1,128], index: 14, kind: input, shape index: {}]   ;;  %s4380_s15 = inlined_call_operand.vmem [shape: f32[2,1,128], index: 15, kind: input, shape index: {}]   ;;  %s4381_s16 = inlined_call_operand.vmem [shape: bf16[128,128], index: 16, kind: input, shape index: {}]   ;;  %s4382_s17 = inlined_call_operand.vmem [shape: f32[1,128], index: 17, kind: input, shape index: {}]   ;;  %s4383_s18 = inlined_call_operand.vmem [shape: bf16[128,128], index: 18, kind: input, shape index: {}]   ;;  %s4384_s19 = inlined_call_operand.vmem [shape: f32[1,128], index: 19, kind: input, shape index: {}]   ;;  %s4385_s20 = inlined_call_operand.hbm [shape: f32[2,1,128], index: 20, kind: output, shape index: {}]  }
   0x1   :  { %4403 = sst [smem:[#allocation27_spill]] %s4365_s0 }
   0x2   :  { %4404 = sst [smem:[#allocation28_spill]] %s4366_s1 }
   0x3   :  { %4405 = sst [smem:[#allocation29_spill]] %s4367_s2 }
   0x4   :  { %4406 = sst [smem:[#allocation30_spill]] %s4368_s3 }
   0x5   :  { %4407 = sst [smem:[#allocation31_spill]] %s4369_s4 }
   0x6   :  { %4408 = sst [smem:[#allocation32_spill]] %s4370_s5 }
   0x7   :  { %4409 = sst [smem:[#allocation33_spill]] %s4371_s6 }
   0x8   :  { %4410 = sst [smem:[#allocation34_spill]] %s4372_s7 }
   0x9   :  { %4411 = sst [smem:[#allocation35_spill]] %s4373_s8 }
   0xa   :  { %4412 = sst [smem:[#allocation36_spill]] %s4374_s9 }
   0xb   :  { %4413 = sst [smem:[#allocation37_spill]] %s4375_s10 }
   0xc   :  { %4414 = sst [smem:[#allocation38_spill]] %s4376_s11 }
   0xd   :  { %4415 = sst [smem:[#allocation39_spill]] %s4377_s12 }
   0xe   :  { %4416 = sst [smem:[#allocation40_spill]] %s4378_s13 }
   0xf   :  { %4417 = sst [smem:[#allocation41_spill]] %s4379_s14 }
  0x10   :  { %4418 = sst [smem:[#allocation42_spill]] %s4380_s15 }
  0x11   :  { %4419 = sst [smem:[#allocation43_spill]] %s4381_s16 }
  0x12   :  { %4420 = sst [smem:[#allocation44_spill]] %s4382_s17 }
  0x13   :  { %4421 = sst [smem:[#allocation45_spill]] %s4383_s18 }
  0x14   :  { %4422 = sst [smem:[#allocation46_spill]] %s4384_s19 }
  0x15   :  { %4423 = sst [smem:[#allocation47_spill]] %s4385_s20 }
  0x16   :  { %25 = vsyncpa [#allocation4], 0 }
  0x17   :  { %27 = vsyncpa [#allocation4 + $0x1], 0 }
  0x18   :  { %28 = vsyncpa [#allocation7], 0 }
  0x19   :  { %30 = vsyncpa [#allocation7 + $0x1], 0 }
  0x1a   :  { %31 = vsyncpa [#allocation5], 0 }
  0x1b   :  { %33 = vsyncpa [#allocation5 + $0x1], 0  ;;  %s3767_s1 = smov 0   ;;  %s3769_s22 = smov 0  }
  0x1c   :  { %s3771_s23 = smov 0   ;;  %s3773_s24 = smov 0  }
  0x1d   :  { %s3775_s2 = smov 0   ;;  %s3777_s25 = smov 0  }
  0x1e   :  { %s3779_s3 = smov 0   ;;  %s3781_s26 = smov 0  }
  0x1f   :  { %s3783_s27 = smov 0   ;;  %s3785_s28 = smov 0  }
  0x20   :  { %s3787_s4 = smov 0  }
  0x21 LB: > { %4424 = sst [smem:[#allocation13_spill]] %s3602_s1  ;;  %s3821_s29 = sadd.s32 4294967295, %s3642_s4   ;;  %s3642_s4 = sphi %s3787_s4, %s39_s4   ;;  %s3638_s28 = sphi %s3785_s28, %s4492_s28   ;;  %s3634_s27 = sphi %s3783_s27, %s4491_s27   ;;  %s3630_s26 = sphi %s3781_s26, %s4490_s26   ;;  %s3626_s3 = sphi %s3779_s3, %s4489_s3   ;;  %s3622_s25 = sphi %s3777_s25, %s4488_s25   ;;  %s3618_s2 = sphi %s3775_s2, %s4487_s2   ;;  %s3614_s24 = sphi %s3773_s24, %s4486_s24   ;;  %s3610_s23 = sphi %s3771_s23, %s4485_s23   ;;  %s3606_s22 = sphi %s3769_s22, %s4494_s22   ;;  %s3602_s1 = sphi %s3767_s1, %s4493_s1  }
  0x22   : > { %4425 = sst [smem:[#allocation14_spill]] %s3610_s23  ;;  %s2860_s30 = sadd.s32 4294967294, %s3642_s4  }
  0x23   : > { %4426 = sst [smem:[#allocation15_spill]] %s3618_s2  ;;  %s48_s0 = sadd.s32 1, %s3634_s27 }
  0x24   : > { %4427 = sst [smem:[#allocation16_spill]] %s3622_s25  ;;  %s51_s21 = sadd.s32 1, %s3638_s28 }
  0x25   : > { %4428 = sst [smem:[#allocation17_spill]] %s3630_s26  ;;  %p49_p0 = scmp.ge.s32.totalorder %s48_s0, 2 }
  0x26   : > { %4429 = sst [smem:[#allocation18_spill]] %s3634_s27  ;;  %s152_s20 = sadd.s32 1, %s3622_s25 }
  0x27   : > { %4430 = sst [smem:[#allocation19_spill]] %s3638_s28  ;;  %p159_p1 = scmp.ne.s32.totalorder %s3622_s25, %s3618_s2 }
  0x28   : > { %4431 = sst [smem:[#allocation20_spill]] %s3642_s4  ;;  %p160_p2 = scmp.eq.s32.totalorder %s3642_s4, 0 }
  0x29   : > { %s4496_s0 = smov (%p49_p0, %s48_s0), 0  ;;  %s4498_s21 = smov (!%p49_p0, %s51_s21), %s3638_s28 }
  0x2a   : > { %4432 = sst [smem:[#allocation21_spill]] %s4496_s0  ;;  %s149_s19 = ssub.s32 %s3634_s27, %s4496_s0 }
  0x2b   : > { %p3835_p3 = por %p160_p2, %p159_p1  ;;  %p53_p4 = scmp.ge.s32.totalorder %s4498_s21, 2 }
  0x2c   : > { %p150_p5 = scmp.eq.s32.totalorder %s149_s19, 0  ;;  %p165_p6 = scmp.ne.s32.totalorder %s3618_s2, %s3614_s24 }
  0x2d   : > { %p166_p7 = scmp.eq.s32.totalorder %s3821_s29, 0  ;;  %s4500_s21 = smov (%p53_p4, %s4498_s21), 0 }
  0x2e   : > { %4434 = sst [smem:[#allocation22_spill]] %s4500_s21  ;;  %s545_s16 = ssub.s32 %s3638_s28, %s4500_s21 }
  0x2f   : > { %s3844_s18 = scalar_select %p150_p5, %s3622_s25, %s152_s20  }
  0x30   : > { %p3846_p8 = por %p166_p7, %p165_p6  ;;  %p546_p9 = scmp.eq.s32.totalorder %s545_s16, 0 }
  0x31   : > { %4435 = sst [smem:[#allocation23_spill]] %s3844_s18  ;;  %s548_s15 = sadd.s32 1, %s3610_s23 }
  0x32   : > { %p558_p10 = scmp.ne.s32.totalorder %s3610_s23, %s3606_s22  ;;  %p559_p11 = scmp.eq.s32.totalorder %s3821_s29, 3 }
  0x33   : > { %s3857_s19 = scalar_select %p546_p9, %s3610_s23, %s548_s15  }
  0x34   : > { %p3859_p12 = por %p559_p11, %p558_p10  ;;  %p564_p13 = scmp.ne.s32.totalorder %s3606_s22, %s3602_s1 }
  0x35   : > { %4437 = sst [smem:[#allocation24_spill]] %s3857_s19  ;;  %p565_p0 = scmp.eq.s32.totalorder %s2860_s30, 3 }
  0x36   : > { %s4438_s24 = scalar_select %p3859_p12, 1, 0 }
  0x37   : > { %p3206_p1 = scmp.lt.s32.totalorder %s3642_s4, 4  ;;  %s3867_s20 = sand.u32 1, %s3622_s25  }
  0x38   : > { %4439 = sst [smem:[#allocation25_spill]] %s4438_s24  ;;  %p3869_p2 = por %p565_p0, %p564_p13 }
  0x39   : > { %s670_s16 = sand.u32 1, %s3642_s4   ;;  %p3876_p4 = pnand %p3206_p1, %p3835_p3 }
  0x3a   : > { %s4440_s18 = scalar_select %p3869_p2, 1, 0 }
  0x3b   : > { %s2864_s15 = sshll.u32 %s3867_s20, 7  ;;  %s2983_s28 = sshll.u32 %s3634_s27, 11 }
  0x3c   : > { %4441 = sst [smem:[#allocation26_spill]] %s4440_s18  ;;  %s674_s23 = scalar_lea.vmem [#allocation6], %s2864_s15 }
  0x3d   : > { %s4443_s10 = sld [smem:[#allocation37_spill]]  ;;  %s681_s1 = sshll.u32 %s674_s23, 4  ;;  %s682_s1 = int_to_ptr.vmem [resolvable:$true] %s681_s1 }
  0x3e   : > { %s3885_s24 = scalar_lea.sflag [#allocation7], %s670_s16  ;;  %p3436_p5 = pneg %p3876_p4 }
  0x3f   : > { %s3447_s17 = scalar_lea.vmem %s682_s1, 2048  ;;  %s3644_s18 = smov [#allocation6]  }
  0x40   : > { %p3448_p3 = scmp.ne.s32.totalorder %s682_s1, %s3447_s17  ;;  %s3452_s14 = sshll.u32 %s3644_s18, 4  ;;  %s3453_s14 = int_to_ptr.vmem [resolvable:$false] %s3452_s14 }
  0x41   : > { %s3454_s11 = scalar_lea.vmem %s3453_s14, 4096  ;;  %p3455_p9 = scmp.lt.s32.totalorder %s682_s1, %s3453_s14 }
  0x42   : > { %p3450_p6 = pnand %p3448_p3, %p3436_p5  ;;  %p3456_p10 = scmp.lt.s32.totalorder %s3454_s11, %s3447_s17 }
  0x43   : > { %s680_s25 = scalar_lea.hbm %s4443_s10, %s2983_s28 }
  0x44   : > { %p3451_p7 = pneg %p3450_p6  ;;  %p3457_p11 = por %p3456_p10, %p3455_p9 }
  0x46   : > { %p3458_p13 = pnand %p3457_p11, %p3451_p7 }
  0x48   : > { %3461 = shalt.err (!%p3458_p13)
}
  0x49   : > { %s3645_s23 = smov 128   ;;  %s3646_s19 = smov 8  }
  0x4a   : > { %3198 = dma.hbm_to_vmem [thread:$0]  (!%p3876_p4), %s680_s25, 2048, %s682_s1, %s3885_s24, %s3645_s23, %s3645_s23, %s3646_s19  }
  0x4b   : > { %s4444_s12 = sld [smem:[#allocation39_spill]]  ;;  %s702_s11 = scalar_lea.vmem [#allocation8], %s2864_s15 }
  0x4c   : > { %s709_s14 = sshll.u32 %s702_s11, 4  ;;  %p2870_p0 = scmp.ge.s32.totalorder %s3642_s4, 1  ;;  %s3900_s14 = int_to_ptr.vmem [resolvable:$true] %s709_s14 }
  0x4d   : > { %p735_p1 = scmp.lt.s32.totalorder %s3642_s4, 5  ;;  %s3180_s10 = smul.u32 192, %s3867_s20 }
  0x4e   : > { %s3181_s13 = smul.u32 3072, %s3634_s27  ;;  %s4446_s25 = sld [smem:[#allocation31_spill]] }
  0x4f   : > { %p3904_p3 = pnand %p2870_p0, %p735_p1  ;;  %s620_s19 = scalar_lea.vmem [#allocation3], %s3180_s10 }
  0x50   : > { %s617_s16 = scalar_lea.sflag [#allocation4], %s3867_s20  ;;  %s3647_s18 = smov [#allocation3]  }
  0x51   : > { %s3898_s30 = scalar_lea.hbm %s4444_s12, %s2983_s28  ;;  %s627_s28 = sshll.u32 %s620_s19, 4  ;;  %s628_s28 = int_to_ptr.vmem [resolvable:$true] %s627_s28 }
  0x52   : > { %s3475_s15 = scalar_lea.vmem %s628_s28, 3072  ;;  %s3480_s11 = sshll.u32 %s3647_s18, 4  ;;  %s3481_s11 = int_to_ptr.vmem [resolvable:$false] %s3480_s11 }
  0x53   : > { %p3476_p6 = scmp.ne.s32.totalorder %s628_s28, %s3475_s15  ;;  %s3482_s12 = scalar_lea.vmem %s3481_s11, 6144 }
  0x54   : > { %s626_s23 = scalar_lea.hbm %s4446_s25, %s3181_s13  ;;  %p3483_p10 = scmp.lt.s32.totalorder %s628_s28, %s3481_s11 }
  0x55   : > { %p3478_p7 = pnand %p3476_p6, %p3436_p5  ;;  %p3484_p11 = scmp.lt.s32.totalorder %s3482_s12, %s3475_s15 }
  0x57   : > { %p3479_p9 = pneg %p3478_p7  ;;  %p3485_p13 = por %p3484_p11, %p3483_p10 }
  0x59   : > { %p3486_p0 = pnand %p3485_p13, %p3479_p9 }
  0x5b   : > { %3489 = shalt.err (!%p3486_p0)
}
  0x5c   : > { %s3648_s9 = smov 192   ;;  %s3649_s10 = smov 12  }
  0x5d   : > { %3195 = dma.hbm_to_vmem [thread:$0]  (!%p3876_p4), %s626_s23, 3072, %s628_s28, %s617_s16, %s3648_s9, %s3648_s9, %s3649_s10  }
  0x5e   : > { %s3503_s13 = scalar_lea.vmem %s3900_s14, 2048  ;;  %s3650_s20 = smov [#allocation8]  }
  0x5f   : > { %p3504_p1 = scmp.ne.s32.totalorder %s3900_s14, %s3503_s13  ;;  %s3508_s12 = sshll.u32 %s3650_s20, 4  ;;  %s3509_s12 = int_to_ptr.vmem [resolvable:$false] %s3508_s12 }
  0x60   : > { %s3510_s1 = scalar_lea.vmem %s3509_s12, 4096  ;;  %p3511_p9 = scmp.lt.s32.totalorder %s3900_s14, %s3509_s12 }
  0x61   : > { %p3506_p6 = pnand %p3504_p1, %p3436_p5  ;;  %p3512_p10 = scmp.lt.s32.totalorder %s3510_s1, %s3503_s13 }
  0x63   : > { %p3507_p7 = pneg %p3506_p6  ;;  %p3513_p11 = por %p3512_p10, %p3511_p9 }
  0x65   : > { %p3514_p13 = pnand %p3513_p11, %p3507_p7 }
  0x67   : > { %3517 = shalt.err (!%p3514_p13)
}
  0x68   : > { %s3651_s25 = smov 64   ;;  %s3652_s23 = smov 4  }
  0x69   : > { %3201 = dma.hbm_to_vmem [thread:$0]  (!%p3876_p4), %s3898_s30, 2048, %s3900_s14, %s3885_s24, %s3651_s25, %s3651_s25, %s3652_s23  }
  0x6a   : > { %739 = sbr.rel (%p3904_p3) target bundleno = 4739 (0x1283), region = 100  ;;  %s3933_s19 = sand.u32 (!%p3904_p3), 1, %s3618_s2  }
  0x6b   : > { %s3182_s28 = smul.u32 (!%p3904_p3), 192, %s3933_s19  ;;  %s742_s16 = scalar_lea.sflag (!%p3904_p3), [#allocation4], %s3933_s19 }
  0x6d   : > { %s3937_s15 = scalar_lea.vmem (!%p3904_p3), [#allocation3], %s3182_s28 }
  0x6f   : > { %3589 = dma.done.wait (%p3846_p8), %s742_s16, 3072  }
  0x70   : > { %3591 = vsyncadd (%p3846_p8), %s742_s16, 4294964224  ;;  %s750_s21 = sand.u32 1, %s3821_s29   ;;  %s2871_s24 = sshll.u32 %s3933_s19, 7 }
  0x71   : > { %s751_s30 = scalar_lea.sflag [#allocation7], %s750_s21  ;;  %s3945_s14 = scalar_lea.vmem [#allocation6], %s2871_s24 }
  0x72   : > { %3593 = dma.done.wait (%p3846_p8), %s751_s30, 4096  }
  0x73   : > { %3595 = vsyncadd (%p3846_p8), %s751_s30, 4294963200  ;;  %p867_p4 = scmp.lt.s32.totalorder %s3630_s26, 1  ;;  %p874_p5 = scmp.lt.s32.totalorder %s3626_s3, 1 }
  0x74   : > { %s4448_s1 = sld [smem:[#allocation27_spill]]  ;;  %s4010_s20 = scalar_lea.vmem [#allocation8], %s2871_s24 }
  0x75   : > { %s3955_s18 = scalar_select %p867_p4, %s3630_s26, 1 }
  0x76   : > { %s3958_s29 = scalar_select %p874_p5, %s3626_s3, 1 }
  0x77   : > { %s2873_s0 = sshll.u32 %s3955_s18, 3  ;;  %s4450_s5 = sld [smem:[#allocation32_spill]] }
  0x78   : > { %s3183_s23 = smul.u32 3, %s3958_s29  ;;  %s2985_s19 = sshll.u32 %s3958_s29, 6 }
  0x79   : > { %s4451_s6 = sld [smem:[#allocation33_spill]]  ;;  %s2876_s28 = sshll.u32 %s3958_s29, 1 }
  0x7a   : > { %s870_s25 = scalar_lea.vmem %s4448_s1, %s2873_s0  ;;  %s4453_s1 = sld [smem:[#allocation36_spill]] }
  0x7b   : > { %s4454_s26 = sld [smem:[#allocation40_spill]]  ;;  %s4458_s12 = sand.u32 1, %s3606_s22  }
  0x7c   : > { %s4457_s0 = sld [smem:[#allocation42_spill]]  ;;  %p2877_p8 = scmp.ne.s32.totalorder %s3626_s3, 0 }
  0x7d   : > { %s3977_s27 = scalar_lea.vmem %s4450_s5, %s3183_s23  ;;  %s4455_s5 = sld [smem:[#allocation38_spill]] }
  0x7e   : > { %s4459_s24 = sld [smem:[#allocation29_spill]] (!%p2877_p8) }
  0x7f   : > { %s3982_s11 = scalar_lea.vmem %s4451_s6, %s2985_s19  ;;  %s4456_s19 = sld [smem:[#allocation41_spill]] }
  0x80   : > { %s891_s13 = scalar_lea.vmem %s4453_s1, %s3958_s29  ;;  %s4014_s1 = scalar_lea.vmem [#allocation9], %s4458_s12 }
  0x81   : > { %s898_s17 = scalar_lea.vmem %s4454_s26, %s3958_s29  ;;  %909 = sbr.rel (%p2877_p8) target bundleno = 442 (0x1ba), region = 116 }
  0x82   : > { %s904_s8 = scalar_lea.vmem %s4457_s0, %s3958_s29 }
  0x83   : > { %s4000_s7 = scalar_lea.vmem %s4455_s5, %s2876_s28  ;;  %s4460_s28 = sld [smem:[#allocation30_spill]] (!%p2877_p8) }
  0x85   : > { %s901_s6 = scalar_lea.vmem %s4456_s19, %s3958_s29 }
  0x86   : > { %v910_v0 = vld [vmem:[%s870_s25] sm:$0xff] }
  0x87   : > { %913 = vadd.xlane.f32.xlu0 %v910_v0  ;;  %v2878_v9 = vld [vmem:[%s4459_s24] ss:$0 sm:$0xff] }
  0x89   : > { %v2879_v11 = vld [vmem:[%s4460_s28] ss:$0 sm:$0xff] }
 0x110   : > { %v914_v1 = vpop.xlane.xlu0 %913 }
 0x111   : > { %v916_v2 = vmul.f32 0.0078125, %v914_v1 }
 0x113   : > { %v917_v3 = vsub.f32 %v910_v0, %v916_v2 }
 0x115   : > { %v918_v4 = vmul.f32 %v917_v3, %v917_v3 }
 0x117   : > { %919 = vadd.xlane.f32.xlu0 %v918_v4 }
 0x1a0   : > { %v920_v5 = vpop.xlane.xlu0 %919 }
 0x1a1   : > { %v921_v6 = vmul.f32 0.0078125, %v920_v5 }
 0x1a3   : > { %v922_v7 = vadd.f32 1e-12, %v921_v6 }
 0x1a5   : > { %3310 = vrsqrt.f32 %v922_v7 }
 0x1b2   : > { %v3311_v8 = vpop.eup %3310 }
 0x1b3   : > { %v924_v10 = vmul.f32 %v3311_v8, %v917_v3 }
 0x1b5   : > { %v931_v12 = vmul.f32 %v2878_v9, %v924_v10 }
 0x1b7   : > { %v938_v13 = vadd.f32 %v2879_v11, %v931_v12 }
 0x1b9   : > { %939 = vst [vmem:[#allocation2] sm:$0xff] %v938_v13 }
 0x1ba PF: > { %v3312_v14 = vld [vmem:[%s3937_s15 + $0xac] ss:$12 sps:$4 sm:$0xff]   ;;  %v3314_v15 = vld [vmem:[%s3937_s15 + $0xa8] ss:$12 sps:$4 sm:$0xff]   ;;  %v3653_v16 = vmov 0   ;;  %v3654_v17 = vmov 0.0   ;;  %v976_v42 = vlaneseq }
 0x1bb   : > { %1151 = vmatprep.mubr.bf16.mxu0 %v3653_v16  ;;  %3060 = vmatprep.subr.bf16.mxu1 %v3654_v17  ;;  %v3315_v18 = vld [vmem:[%s3937_s15 + $0x94] ss:$12 sps:$4 sm:$0xff]   ;;  %vm3655_vm0 = vmmov 0   ;;  %v3317_v19 = vld [vmem:[%s3937_s15 + $0x90] ss:$12 sps:$4 sm:$0xff]   ;;  %vm1207_vm1 = vcmask 261120  }
 0x1bc   : > { %1119 = vmatprep.subr.bf16.mxu0 %v3312_v14  ;;  %3076 = vmatprep.mubr.msk.bf16.mxu1 %vm3655_vm0, %v3654_v17  ;;  %v3318_v20 = vld [vmem:[%s3937_s15 + $0x7c] ss:$12 sps:$4 sm:$0xff]   ;;  %v3320_v21 = vld [vmem:[%s3937_s15 + $0x78] ss:$12 sps:$4 sm:$0xff]   ;;  %v3323_v23 = vld [vmem:[%s3937_s15 + $0x60] ss:$12 sps:$4 sm:$0xff]  }
 0x1bd   : > { %1120 = vmatpush1.bf16.msra.mxu0 %v3314_v15  ;;  %v3321_v22 = vld [vmem:[%s3937_s15 + $0x64] ss:$12 sps:$4 sm:$0xff]   ;;  %v3324_v25 = vld [vmem:[%s3937_s15 + $0x4c] ss:$12 sps:$4 sm:$0xff]   ;;  %v3326_v27 = vld [vmem:[%s3937_s15 + $0x48] ss:$12 sps:$4 sm:$0xff]  }
 0x1be   : > { %1121 = vmatprep.subr.bf16.mxu0 %v3315_v18  ;;  %v3336_v24 = vld [vmem:[%s3937_s15 + $0xb0] ss:$12 sps:$4 sm:$0xff]   ;;  %v3337_v26 = vld [vmem:[%s3937_s15 + $0x98] ss:$12 sps:$4 sm:$0xff]   ;;  %v3327_v28 = vld [vmem:[%s3937_s15 + $0x34] ss:$12 sps:$4 sm:$0xff]  }
 0x1bf   : > { %3061 = vmatpush3.bf16.msra.mxu1 %v3336_v24  ;;  %v3329_v29 = vld [vmem:[%s3937_s15 + $0x30] ss:$12 sps:$4 sm:$0xff]   ;;  %v3338_v30 = vld [vmem:[%s3937_s15 + $0x80] ss:$12 sps:$4 sm:$0xff]   ;;  %v3339_v32 = vld [vmem:[%s3937_s15 + $0x68] ss:$12 sps:$4 sm:$0xff]  }
 0x1c0   : > { %3062 = vmatprep.subr.bf16.mxu1 %v3654_v17  ;;  %v3330_v31 = vld [vmem:[%s3937_s15 + $0x1c] ss:$12 sps:$4 sm:$0xff]   ;;  %v3332_v33 = vld [vmem:[%s3937_s15 + $0x18] ss:$12 sps:$4 sm:$0xff]   ;;  %v3335_v36 = vld [vmem:[%s3937_s15] ss:$12 sps:$4 sm:$0xff]  }
 0x1c1   : > { %1122 = vmatpush1.bf16.msra.mxu0 %v3317_v19  ;;  %v3333_v34 = vld [vmem:[%s3937_s15 + $0x4] ss:$12 sps:$4 sm:$0xff]   ;;  %v4051_v37 = vld [vmem:[#allocation2] sm:$0xff]  ;;  %v3342_v40 = vld [vmem:[%s3937_s15 + $0x20] ss:$12 sps:$4 sm:$0xff]   ;;  %v4068_v43 = vshrl.u32 %v976_v42, 7 }
 0x1c2   : > { %1123 = vmatprep.subr.bf16.mxu0 %v3318_v20  ;;  %v3340_v35 = vld [vmem:[%s3937_s15 + $0x50] ss:$12 sps:$4 sm:$0xff]   ;;  %v3341_v38 = vld [vmem:[%s3937_s15 + $0x38] ss:$12 sps:$4 sm:$0xff]   ;;  %v941_v39 = vpack.c.bf16 %v4051_v37, %v4051_v37  ;;  %v3343_v41 = vld [vmem:[%s3937_s15 + $0x8] ss:$12 sps:$4 sm:$0xff]  }
 0x1c3   : > { %3063 = vmatpush3.bf16.msra.mxu1 %v3337_v26  ;;  %v982_v44 = vsub.s32 1, %v4068_v43  ;;  %v974_v45 = vld [vmem:[%s3977_s27] sm:$0x7]  ;;  %v978_v46 = vsub.s32 0, %v4068_v43  ;;  %v986_v52 = vsub.s32 2, %v4068_v43  ;;  %s3656_s15 = smov 96  }
 0x1c4   : > { %3064 = vmatprep.subr.bf16.mxu1 %v3654_v17  ;;  %s4461_s16 = sld [smem:[#allocation28_spill]]  ;;  %vm1284_vm2 = vcmask 64512   ;;  %s3658_s30 = smov 32   ;;  %vm1878_vm3 = vcmask 523264   ;;  %vm1880_vm4 = vcmask 785408  }
 0x1c5   : > { %1124 = vmatpush1.bf16.msra.mxu0 %v3320_v21  ;;  %v983_v47 = vrot.slane %v974_v45, %v982_v44  ;;  %v979_v49 = vrot.slane %v974_v45, %v978_v46  ;;  %v987_v56 = vrot.slane %v974_v45, %v986_v52  ;;  %s4463_s4 = sld [smem:[#allocation34_spill]]  ;;  %p2963_p3 = scmp.ne.s32.totalorder %s3626_s3, 1 }
 0x1c6   : > { %1125 = vmatprep.subr.bf16.mxu0 %v3321_v22  ;;  %s4465_s12 = sld [smem:[#allocation35_spill]] }
 0x1c7   : > { %3065 = vmatpush3.bf16.msra.mxu1 %v3338_v30  ;;  %s4473_s2 = sld [smem:[#allocation45_spill]] (!%p2963_p3) }
 0x1c8   : > { %3066 = vmatprep.subr.bf16.mxu1 %v3654_v17  ;;  %s4476_s10 = sld [smem:[#allocation46_spill]] (!%p2963_p3) }
 0x1c9   : > { %1126 = vmatpush1.bf16.msra.mxu0 %v3323_v23 }
 0x1ca   : > { %1127 = vmatprep.subr.bf16.mxu0 %v3324_v25  ;;  %s4462_s23 = scalar_lea.vmem %s4461_s16, %s3955_s18  ;;  %s3657_s18 = smov 64  }
 0x1cb   : > { %3067 = vmatpush3.bf16.msra.mxu1 %v3339_v32  ;;  %v4102_v62 = vld [vmem:[%s4462_s23] ss:$0 sm:$0xff]  ;;  %s4464_s19 = scalar_lea.vmem %s4463_s4, %s3958_s29  ;;  %s4471_s23 = sld [smem:[#allocation43_spill]] (!%p2963_p3) }
 0x1cc   : > { %3068 = vmatprep.subr.bf16.mxu1 %v3654_v17  ;;  %s4466_s5 = scalar_lea.vmem %s4465_s12, %s3958_s29 }
 0x1cd   : > { %1128 = vmatpush1.bf16.msra.mxu0 %v3326_v27 }
 0x1ce   : > { %1129 = vmatprep.subr.bf16.mxu0 %v3327_v28 }
 0x1cf   : > { %3069 = vmatpush3.bf16.msra.mxu1 %v3340_v35 }
 0x1d0   : > { %3070 = vmatprep.subr.bf16.mxu1 %v3654_v17 }
 0x1d1   : > { %1130 = vmatpush1.bf16.msra.mxu0 %v3329_v29 }
 0x1d2   : > { %1131 = vmatprep.subr.bf16.mxu0 %v3330_v31 }
 0x1d3   : > { %3071 = vmatpush3.bf16.msra.mxu1 %v3341_v38 }
 0x1d4   : > { %3072 = vmatprep.subr.bf16.mxu1 %v3654_v17 }
 0x1d5   : > { %1132 = vmatpush1.bf16.msra.mxu0 %v3332_v33 }
 0x1d6   : > { %1133 = vmatprep.subr.bf16.mxu0 %v3333_v34 }
 0x1d7   : > { %3073 = vmatpush3.bf16.msra.mxu1 %v3342_v40 }
 0x1d8   : > { %3074 = vmatprep.subr.bf16.mxu1 %v3654_v17 }
 0x1d9   : > { %1134 = vmatpush1.bf16.msra.mxu0 %v3335_v36 }
 0x1da   : > { %3120 = vmatprep.subr.bf16.mxu0 %v3654_v17 }
 0x1db   : > { %3075 = vmatpush3.bf16.msra.mxu1 %v3343_v41 }
 0x1dc   : > { %1152 = vmatmul.mubr.bf16.vlgmr.msra.gmra.mxu0 %v941_v39  ;;  %3080 = vmatprep.subr.mxu1 %v3654_v17 }
 0x1dd   : > { %3136 = vmatprep.mubr.msk.bf16.mxu0 %vm3655_vm0, %v3654_v17 }
 0x1de   : > { %3077 = vmatmul.mubr.bf16.vlgmr.msra.gmra.mxu1 %v941_v39 }
 0x1df   : > { %3082 = vmatprep.mubr.msk.f32.mxu1 %vm3655_vm0, %v3654_v17 }
 0x29c   : > { %v1153_v48 = vpop.f32.mrf.mxu0 }
 0x29d   : > { %v4084_v54 = vadd.f32 %v1153_v48, %v979_v49 }
 0x29e   : > { %v1155_v50 = vpop.f32.mrf.mxu0  ;;  %v1194_v57 = vpop.f32.mrf.mxu1 }
 0x29f   : > { %v4077_v51 = vadd.f32 %v1155_v50, %v983_v47  ;;  %v4093_v58 = vadd.f32 %v1194_v57, %v987_v56 }
 0x2a0   : > { %v1157_v53 = vpop.f32.mrf.mxu0  ;;  %v3078_v59 = vpop.f32.mrf.mxu1 }
 0x2a1   : > { %1371 = vrot.lane.b32.xlu1 %v4077_v51, %s3656_s15  ;;  %3081 = vmatpush3.xpose.msk.msra.mxu1 %vm1207_vm1, %v4077_v51 }
 0x2a2   : > { %v1158_v55 = vpop.f32.mrf.mxu0  ;;  %3085 = vmatprep.subr.mxu1 %v3654_v17  ;;  %v1197_v60 = vpop.f32.mrf.mxu1 }
 0x2a4   : > { %3083 = vmatmul.mubr.msk.f32.vlgmr.msra.gmra.mxu1 %vm1207_vm1, %v4084_v54  ;;  %v3079_v61 = vpop.f32.mrf.mxu1 }
 0x2a5   : > { %1369 = vrot.lane.b32.xlu1 %v4084_v54, %s3656_s15  ;;  %3087 = vmatprep.mubr.msk.f32.mxu1 %vm3655_vm0, %v3654_v17 }
 0x2a6   : > { %3086 = vmatpush3.msra.mxu1 %v4093_v58 }
 0x2a7   : > { %3090 = vmatprep.subr.mxu1 %v3654_v17 }
 0x313   : > { %v1372_v10 = vpop.permute.xlu1 %1371 }
 0x317   : > { %v1370_v12 = vpop.permute.xlu1 %1369 }
 0x364   : > { %v1280_v63 = vpop.f32.mrf.mxu1 }
 0x365   : > { %v1281_v0 = vadd.f32 %v4102_v62, %v1280_v63 }
 0x366   : > { %v3084_v1 = vpop.f32.mrf.mxu1 }
 0x367   : > { %v1285_v2 = vsel %vm1284_vm2, %v1281_v0, -inf }
 0x368   : > { %1286 = vmax.xlane.f32.xlu0 %v1285_v2 }
 0x3f1   : > { %v1287_v3 = vpop.xlane.xlu0 %1286 }
 0x3f2   : > { %v1288_v4 = vsub.f32 %v1281_v0, %v1287_v3 }
 0x3f4   : > { %v1289_v5 = vmul.f32 1.442695, %v1288_v4  ;;  %v3344_v4 = vld [vmem:[%s3982_s11 + $0x38] sm:$0xff]  }
 0x3f5   : > { %3121 = vmatpush3.bf16.msra.mxu0 %v3344_v4  ;;  %v3383_v4 = vld [vmem:[%s4010_s20 + $0x20] sm:$0xff]  }
 0x3f6   : > { %3392 = vpow2.f32 %v1289_v5  ;;  %v3345_v5 = vld [vmem:[%s3982_s11 + $0x30] sm:$0xff]   ;;  %3122 = vmatprep.subr.bf16.mxu0 %v3654_v17 }
 0x3f9   : > { %3123 = vmatpush3.bf16.msra.mxu0 %v3345_v5  ;;  %v3384_v5 = vld [vmem:[%s4010_s20 + $0x58] sm:$0xff]  }
 0x3fa   : > { %3124 = vmatprep.subr.bf16.mxu0 %v3654_v17 }
 0x403   : > { %v3393_v6 = vpop.eup %3392 }
 0x404   : > { %v1291_v7 = vsel %vm1284_vm2, %v3393_v6, 0.0 }
 0x405   : > { %1292 = vadd.xlane.f32.xlu0 %v1291_v7  ;;  %v3347_v7 = vld [vmem:[%s3982_s11 + $0x20] sm:$0xff]  }
 0x48e   : > { %v1293_v8 = vpop.xlane.xlu0 %1292 }
 0x48f   : > { %3394 = vrcp.f32 %v1293_v8  ;;  %v3348_v8 = vld [vmem:[%s3982_s11 + $0x18] sm:$0xff]  }
 0x49c   : > { %v3395_v9 = vpop.eup %3394 }
 0x49d   : > { %v1295_v11 = vmul.f32 %v3395_v9, %v3393_v6  ;;  %v3346_v6 = vld [vmem:[%s3982_s11 + $0x28] sm:$0xff]  }
 0x49e   : > { %3125 = vmatpush3.bf16.msra.mxu0 %v3346_v6  ;;  %v3350_v9 = vld [vmem:[%s3982_s11 + $0x8] sm:$0xff]   ;;  %v3385_v6 = vld [vmem:[%s4010_s20 + $0x18] sm:$0xff]  }
 0x49f   : > { %3088 = vmatmul.mubr.msk.f32.vlgmr.msra.gmra.mxu1 %vm1284_vm2, %v1295_v11  ;;  %3126 = vmatprep.subr.bf16.mxu0 %v3654_v17 }
 0x4a0   : > { %3091 = vmatpush3.xpose.msk.msra.mxu1 %vm1207_vm1, %v1372_v10  ;;  %3092 = vmatprep.mubr.msk.f32.mxu1 %vm3655_vm0, %v3654_v17  ;;  %v3351_v10 = vld [vmem:[%s3982_s11] sm:$0xff]  }
 0x4a1   : > { %3095 = vmatprep.subr.mxu1 %v3654_v17 }
 0x4a2   : > { %3127 = vmatpush3.bf16.msra.mxu0 %v3347_v7  ;;  %v3386_v7 = vld [vmem:[%s4010_s20 + $0x50] sm:$0xff]  }
 0x4a3   : > { %3093 = vmatmul.mubr.msk.f32.vlgmr.msra.gmra.mxu1 %vm1207_vm1, %v1370_v12  ;;  %3128 = vmatprep.subr.bf16.mxu0 %v3654_v17 }
 0x4a4   : > { %3097 = vmatprep.mubr.msk.f32.mxu1 %vm3655_vm0, %v3654_v17 }
 0x4a6   : > { %3129 = vmatpush3.bf16.msra.mxu0 %v3348_v8  ;;  %v3387_v8 = vld [vmem:[%s4010_s20 + $0x10] sm:$0xff]  }
 0x4a7   : > { %3130 = vmatprep.subr.bf16.mxu0 %v3654_v17 }
 0x55f   : > { %v4115_v13 = vpop.f32.mrf.mxu1 }
 0x561   : > { %v3089_v14 = vpop.f32.mrf.mxu1 }
 0x563   : > { %v1443_v15 = vpop.f32.mrf.mxu1 }
 0x564   : > { %v1444_v18 = vadd.f32 %v4102_v62, %v1443_v15 }
 0x565   : > { %v3094_v19 = vpop.f32.mrf.mxu1 }
 0x566   : > { %v1447_v20 = vsel %vm1284_vm2, %v1444_v18, -inf }
 0x567   : > { %1448 = vmax.xlane.f32.xlu0 %v1447_v20 }
 0x57d   : > { %1459 = vrot.lane.b32.xlu0 %v4093_v58, %s3656_s15 }
 0x581   : > { %1537 = vrot.lane.b32.xlu0 %v4077_v51, %s3657_s18 }
 0x585   : > { %1535 = vrot.lane.b32.xlu0 %v4084_v54, %s3657_s18 }
 0x5f0   : > { %v1449_v21 = vpop.xlane.xlu0 %1448 }
 0x5f1   : > { %v1450_v22 = vsub.f32 %v1444_v18, %v1449_v21 }
 0x5f3   : > { %v1451_v23 = vmul.f32 1.442695, %v1450_v22  ;;  %v2917_v22 = vld [vmem:[%s4464_s19] ss:$0 sm:$0xff]  ;;  %s4474_s19 = smov (!%p2963_p3), %s4473_s2 }
 0x5f4   : > { %v1460_v24 = vpop.permute.xlu0 %1459 }
 0x5f5   : > { %3396 = vpow2.f32 %v1451_v23  ;;  %3096 = vmatpush3.msra.mxu1 %v1460_v24 }
 0x5f6   : > { %3100 = vmatprep.subr.mxu1 %v3654_v17 }
 0x5f8   : > { %v1538_v29 = vpop.permute.xlu0 %1537 }
 0x5fc   : > { %v1536_v31 = vpop.permute.xlu0 %1535 }
 0x602   : > { %v3397_v25 = vpop.eup %3396 }
 0x603   : > { %v1453_v26 = vsel %vm1284_vm2, %v3397_v25, 0.0 }
 0x604   : > { %1454 = vadd.xlane.f32.xlu1 %v1453_v26 }
 0x615   : > { %1624 = vrot.lane.b32.xlu1 %v4093_v58, %s3657_s18 }
 0x619   : > { %1702 = vrot.lane.b32.xlu1 %v4077_v51, %s3658_s30 }
 0x68d   : > { %v1455_v27 = vpop.xlane.xlu1 %1454 }
 0x68e   : > { %3398 = vrcp.f32 %v1455_v27 }
 0x691   : > { %v1625_v32 = vpop.permute.xlu1 %1624 }
 0x695   : > { %v1703_v48 = vpop.permute.xlu1 %1702 }
 0x69b   : > { %v3399_v28 = vpop.eup %3398 }
 0x69c   : > { %v1457_v30 = vmul.f32 %v3399_v28, %v3397_v25  ;;  %v3352_v28 = vld [vmem:[%s3945_s14 + $0x70] ss:$8 sps:$4 sm:$0xff]  }
 0x69e   : > { %3098 = vmatmul.mubr.msk.f32.vlgmr.msra.gmra.mxu1 %vm1284_vm2, %v1457_v30  ;;  %v3357_v30 = vld [vmem:[%s3945_s14 + $0x64] ss:$8 sps:$4 sm:$0xff]  }
 0x69f   : > { %3101 = vmatpush3.xpose.msk.msra.mxu1 %vm1207_vm1, %v1538_v29  ;;  %3102 = vmatprep.mubr.msk.f32.mxu1 %vm3655_vm0, %v3654_v17  ;;  %v3354_v29 = vld [vmem:[%s3945_s14 + $0x74] ss:$8 sps:$4 sm:$0xff]  }
 0x6a0   : > { %3105 = vmatprep.subr.mxu1 %v3654_v17 }
 0x6a2   : > { %3103 = vmatmul.mubr.msk.f32.vlgmr.msra.gmra.mxu1 %vm1207_vm1, %v1536_v31  ;;  %v3355_v31 = vld [vmem:[%s3945_s14 + $0x60] ss:$8 sps:$4 sm:$0xff]  }
 0x6a3   : > { %3106 = vmatpush3.msra.mxu1 %v1625_v32  ;;  %3107 = vmatprep.mubr.msk.f32.mxu1 %vm3655_vm0, %v3654_v17 }
 0x6a4   : > { %3110 = vmatprep.subr.mxu1 %v3654_v17 }
 0x75e   : > { %v1531_v33 = vpop.f32.mrf.mxu1 }
 0x760   : > { %v3099_v34 = vpop.f32.mrf.mxu1 }
 0x762   : > { %v1609_v35 = vpop.f32.mrf.mxu1 }
 0x763   : > { %v1610_v36 = vadd.f32 %v4102_v62, %v1609_v35  ;;  %v3360_v35 = vld [vmem:[%s3945_s14 + $0x54] ss:$8 sps:$4 sm:$0xff]  }
 0x764   : > { %v3104_v38 = vpop.f32.mrf.mxu1 }
 0x765   : > { %v1613_v39 = vsel %vm1284_vm2, %v1610_v36, -inf  ;;  %v3361_v38 = vld [vmem:[%s3945_s14 + $0x40] ss:$8 sps:$4 sm:$0xff]  }
 0x766   : > { %1614 = vmax.xlane.f32.xlu0 %v1613_v39  ;;  %v3363_v39 = vld [vmem:[%s3945_s14 + $0x44] ss:$8 sps:$4 sm:$0xff]  }
 0x7ef   : > { %v1615_v40 = vpop.xlane.xlu0 %1614 }
 0x7f0   : > { %v1616_v41 = vsub.f32 %v1610_v36, %v1615_v40  ;;  %v3358_v36 = vld [vmem:[%s3945_s14 + $0x50] ss:$8 sps:$4 sm:$0xff]   ;;  %v3366_v40 = vld [vmem:[%s3945_s14 + $0x34] ss:$8 sps:$4 sm:$0xff]  }
 0x7f2   : > { %v1617_v42 = vmul.f32 1.442695, %v1616_v41  ;;  %v3364_v41 = vld [vmem:[%s3945_s14 + $0x30] ss:$8 sps:$4 sm:$0xff]  }
 0x7f4   : > { %3400 = vpow2.f32 %v1617_v42  ;;  %v3369_v42 = vld [vmem:[%s3945_s14 + $0x24] ss:$8 sps:$4 sm:$0xff]  }
 0x801   : > { %v3401_v45 = vpop.eup %3400 }
 0x802   : > { %v1619_v47 = vsel %vm1284_vm2, %v3401_v45, 0.0 }
 0x803   : > { %1620 = vadd.xlane.f32.xlu1 %v1619_v47  ;;  %v3372_v47 = vld [vmem:[%s3945_s14 + $0x14] ss:$8 sps:$4 sm:$0xff]  }
 0x814   : > { %1700 = vrot.lane.b32.xlu1 %v4084_v54, %s3658_s30 }
 0x88c   : > { %v1621_v49 = vpop.xlane.xlu1 %1620 }
 0x88d   : > { %3402 = vrcp.f32 %v1621_v49  ;;  %v3375_v49 = vld [vmem:[%s3945_s14 + $0x4] ss:$8 sps:$4 sm:$0xff]  }
 0x890   : > { %v1701_v52 = vpop.permute.xlu1 %1700 }
 0x89a   : > { %v3403_v50 = vpop.eup %3402 }
 0x89b   : > { %v1623_v51 = vmul.f32 %v3403_v50, %v3401_v45  ;;  %v3367_v45 = vld [vmem:[%s3945_s14 + $0x20] ss:$8 sps:$4 sm:$0xff]  }
 0x89c   : > { %v3373_v50 = vld [vmem:[%s3945_s14] ss:$8 sps:$4 sm:$0xff]  }
 0x89d   : > { %3108 = vmatmul.mubr.msk.f32.vlgmr.msra.gmra.mxu1 %vm1284_vm2, %v1623_v51 }
 0x89e   : > { %3111 = vmatpush3.xpose.msk.msra.mxu1 %vm1207_vm1, %v1703_v48  ;;  %3112 = vmatprep.mubr.msk.f32.mxu1 %vm3655_vm0, %v3654_v17  ;;  %v3370_v48 = vld [vmem:[%s3945_s14 + $0x10] ss:$8 sps:$4 sm:$0xff]  }
 0x89f   : > { %3115 = vmatprep.subr.mxu1 %v3654_v17 }
 0x8a1   : > { %3113 = vmatmul.mubr.msk.f32.vlgmr.msra.gmra.mxu1 %vm1207_vm1, %v1701_v52 }
 0x8a2   : > { %3117 = vmatprep.mubr.msk.f32.mxu1 %vm3655_vm0, %v3654_v17 }
 0x95d   : > { %v1696_v53 = vpop.f32.mrf.mxu1 }
 0x95f   : > { %v3109_v54 = vpop.f32.mrf.mxu1 }
 0x961   : > { %v1774_v55 = vpop.f32.mrf.mxu1 }
 0x962   : > { %v1775_v56 = vadd.f32 %v4102_v62, %v1774_v55  ;;  %v2926_v55 = vld [vmem:[%s4466_s5] ss:$0 sm:$0xff] }
 0x963   : > { %v3114_v57 = vpop.f32.mrf.mxu1 }
 0x964   : > { %v1778_v59 = vsel %vm1284_vm2, %v1775_v56, -inf  ;;  %v2927_v57 = vld [vmem:[%s891_s13] ss:$0 sm:$0xff] }
 0x965   : > { %1779 = vmax.xlane.f32.xlu0 %v1778_v59 }
 0x97b   : > { %1789 = vrot.lane.b32.xlu0 %v4093_v58, %s3658_s30 }
 0x97f   : > { %1866 = vrot.lane.b32.xlu0 %v1531_v33, %s3658_s30 }
 0x983   : > { %1870 = vrot.lane.b32.xlu0 %v1696_v53, %s3657_s18  ;;  %s4472_s18 = smov (!%p2963_p3), %s4471_s23 }
 0x9ee   : > { %v1780_v60 = vpop.xlane.xlu0 %1779 }
 0x9ef   : > { %v1781_v61 = vsub.f32 %v1775_v56, %v1780_v60 }
 0x9f1   : > { %v1782_v63 = vmul.f32 1.442695, %v1781_v61 }
 0x9f2   : > { %v1790_v0 = vpop.permute.xlu0 %1789 }
 0x9f3   : > { %3404 = vpow2.f32 %v1782_v63  ;;  %3116 = vmatpush3.msra.mxu1 %v1790_v0  ;;  %v3376_v63 = vld [vmem:[%s4010_s20 + $0x78] sm:$0xff]  }
 0x9f4   : > { %2132 = vmatprep.subr.bf16.mxu1 %v3354_v29  ;;  %v3377_v0 = vld [vmem:[%s4010_s20 + $0x38] sm:$0xff]  }
 0x9f6   : > { %v1867_v14 = vpop.permute.xlu0 %1866 }
 0x9f7   : > { %v1877_v18 = vsel %vm1207_vm1, %v4115_v13, %v1867_v14 }
 0x9fa   : > { %v1871_v15 = vpop.permute.xlu0 %1870 }
 0x9fb   : > { %v1879_v19 = vsel %vm1878_vm3, %v1877_v18, %v1871_v15 }
 0xa00   : > { %v3405_v62 = vpop.eup %3404 }
 0xa01   : > { %v1784_v1 = vsel %vm1284_vm2, %v3405_v62, 0.0 }
 0xa02   : > { %1785 = vadd.xlane.f32.xlu1 %v1784_v1  ;;  %v3379_v1 = vld [vmem:[%s4010_s20 + $0x30] sm:$0xff]  }
 0xa8b   : > { %v1786_v2 = vpop.xlane.xlu1 %1785 }
 0xa8c   : > { %3406 = vrcp.f32 %v1786_v2  ;;  %v3380_v2 = vld [vmem:[%s4010_s20 + $0x68] sm:$0xff]  }
 0xa99   : > { %v3407_v58 = vpop.eup %3406 }
 0xa9a   : > { %v1788_v3 = vmul.f32 %v3407_v58, %v3405_v62  ;;  %v3378_v62 = vld [vmem:[%s4010_s20 + $0x70] sm:$0xff]   ;;  %v3381_v58 = vld [vmem:[%s4010_s20 + $0x28] sm:$0xff]  }
 0xa9c   : > { %3118 = vmatmul.mubr.msk.f32.vlgmr.msra.gmra.mxu1 %vm1284_vm2, %v1788_v3  ;;  %v3382_v3 = vld [vmem:[%s4010_s20 + $0x60] sm:$0xff]  }
 0xa9d   : > { %2164 = vmatprep.mubr.bf16.mxu1 %v3653_v16  ;;  %v3349_v16 = vld [vmem:[%s3982_s11 + $0x10] sm:$0xff]   ;;  %2133 = vmatpush1.bf16.msra.mxu1 %v3352_v28 }
 0xa9e   : > { %3131 = vmatpush3.bf16.msra.mxu0 %v3349_v16  ;;  %2134 = vmatprep.subr.bf16.mxu1 %v3357_v30  ;;  %v3388_v16 = vld [vmem:[%s4010_s20 + $0x48] sm:$0xff]  }
 0xa9f   : > { %3132 = vmatprep.subr.bf16.mxu0 %v3654_v17 }
 0xaa1   : > { %2135 = vmatpush1.bf16.msra.mxu1 %v3355_v31 }
 0xaa2   : > { %3133 = vmatpush3.bf16.msra.mxu0 %v3350_v9  ;;  %2136 = vmatprep.subr.bf16.mxu1 %v3360_v35  ;;  %v3389_v9 = vld [vmem:[%s4010_s20 + $0x8] sm:$0xff]  }
 0xaa3   : > { %3134 = vmatprep.subr.bf16.mxu0 %v3654_v17 }
 0xaa5   : > { %2137 = vmatpush1.bf16.msra.mxu1 %v3358_v36 }
 0xaa6   : > { %3135 = vmatpush3.bf16.msra.mxu0 %v3351_v10  ;;  %2138 = vmatprep.subr.bf16.mxu1 %v3363_v39  ;;  %v3390_v10 = vld [vmem:[%s4010_s20 + $0x40] sm:$0xff]  }
 0xaa7   : > { %3020 = vmatprep.subr.bf16.mxu0 %v3376_v63 }
 0xaa9   : > { %2139 = vmatpush1.bf16.msra.mxu1 %v3361_v38 }
 0xaaa   : > { %2140 = vmatprep.subr.bf16.mxu1 %v3366_v40  ;;  %v2944_v40 = vld [vmem:[%s898_s17] ss:$0 sm:$0xff] }
 0xaad   : > { %2141 = vmatpush1.bf16.msra.mxu1 %v3364_v41 }
 0xaae   : > { %2142 = vmatprep.subr.bf16.mxu1 %v3369_v42 }
 0xab1   : > { %2143 = vmatpush1.bf16.msra.mxu1 %v3367_v45 }
 0xab2   : > { %2144 = vmatprep.subr.bf16.mxu1 %v3372_v47 }
 0xab5   : > { %2145 = vmatpush1.bf16.msra.mxu1 %v3370_v48 }
 0xab6   : > { %2146 = vmatprep.subr.bf16.mxu1 %v3375_v49 }
 0xab9   : > { %2147 = vmatpush1.bf16.msra.mxu1 %v3373_v50 }
 0xb5c   : > { %v1861_v11 = vpop.f32.mrf.mxu1 }
 0xb5d   : > { %1874 = vrot.lane.b32.xlu0 %v1861_v11, %s3656_s15  ;;  %v3391_v11 = vld [vmem:[%s4010_s20] sm:$0xff]  }
 0xb5e   : > { %v3119_v12 = vpop.f32.mrf.mxu1 }
 0xb5f   : > { %v2040_v12 = vld [vmem:[%s4000_s7] sm:$0x3] }
 0xb60   : > { %v2045_v14 = vrot.slane %v2040_v12, %v978_v46  ;;  %v2049_v15 = vrot.slane %v2040_v12, %v982_v44 }
 0xbcf   : > { %v1875_v20 = vpop.permute.xlu0 %1874 }
 0xbd0   : > { %v1881_v17 = vsel %vm1880_vm4, %v1879_v19, %v1875_v20 }
 0xbd1   : > { %v1882_v21 = vpack.c.bf16 %v1881_v17, %v1881_v17 }
 0xbd3   : > { %3137 = vmatmul.mubr.bf16.vlgmr.msra.gmra.mxu0 %v1882_v21 }
 0xbd4   : > { %3021 = vmatpush3.bf16.msra.mxu0 %v3377_v0 }
 0xbd5   : > { %3022 = vmatprep.subr.bf16.mxu0 %v3378_v62 }
 0xbd8   : > { %3023 = vmatpush3.bf16.msra.mxu0 %v3379_v1 }
 0xbd9   : > { %3024 = vmatprep.subr.bf16.mxu0 %v3380_v2 }
 0xbdc   : > { %3025 = vmatpush3.bf16.msra.mxu0 %v3381_v58 }
 0xbdd   : > { %3026 = vmatprep.subr.bf16.mxu0 %v3382_v3 }
 0xbe0   : > { %3027 = vmatpush3.bf16.msra.mxu0 %v3383_v4 }
 0xbe1   : > { %3028 = vmatprep.subr.bf16.mxu0 %v3384_v5 }
 0xbe4   : > { %3029 = vmatpush3.bf16.msra.mxu0 %v3385_v6 }
 0xbe5   : > { %3030 = vmatprep.subr.bf16.mxu0 %v3386_v7 }
 0xbe8   : > { %3031 = vmatpush3.bf16.msra.mxu0 %v3387_v8 }
 0xbe9   : > { %3032 = vmatprep.subr.bf16.mxu0 %v3388_v16 }
 0xbec   : > { %3033 = vmatpush3.bf16.msra.mxu0 %v3389_v9 }
 0xbed   : > { %3034 = vmatprep.subr.bf16.mxu0 %v3390_v10 }
 0xbf0   : > { %3035 = vmatpush3.bf16.msra.mxu0 %v3391_v11 }
 0xc93   : > { %v1988_v23 = vpop.f32.mrf.mxu0 }
 0xc94   : > { %v1989_v24 = vadd.f32 %v2917_v22, %v1988_v23 }
 0xc95   : > { %v3138_v25 = vpop.f32.mrf.mxu0 }
 0xc96   : > { %v1994_v26 = vadd.f32 %v1989_v24, %v4051_v37 }
 0xc97   : > { %v1991_v27 = vpop.f32.mrf.mxu0 }
 0xc98   : > { %1997 = vadd.xlane.f32.xlu1 %v1994_v26 }
 0xc99   : > { %v3139_v13 = vpop.f32.mrf.mxu0 }
 0xd21   : > { %v1998_v32 = vpop.xlane.xlu1 %1997 }
 0xd22   : > { %v2000_v37 = vmul.f32 0.0078125, %v1998_v32 }
 0xd24   : > { %v2001_v33 = vsub.f32 %v1994_v26, %v2000_v37 }
 0xd26   : > { %v2002_v34 = vmul.f32 %v2001_v33, %v2001_v33 }
 0xd28   : > { %2003 = vadd.xlane.f32.xlu0 %v2002_v34 }
 0xdb1   : > { %v2004_v51 = vpop.xlane.xlu0 %2003 }
 0xdb2   : > { %v2005_v52 = vmul.f32 0.0078125, %v2004_v51 }
 0xdb4   : > { %v2006_v53 = vadd.f32 1e-12, %v2005_v52 }
 0xdb6   : > { %3408 = vrsqrt.f32 %v2006_v53 }
 0xdc3   : > { %v3409_v54 = vpop.eup %3408 }
 0xdc4   : > { %v2008_v56 = vmul.f32 %v3409_v54, %v2001_v33 }
 0xdc6   : > { %v2015_v59 = vmul.f32 %v2926_v55, %v2008_v56 }
 0xdc8   : > { %v4212_v60 = vadd.f32 %v2927_v57, %v2015_v59  ;;  %v2961_v59 = vld [vmem:[%s901_s6] ss:$0 sm:$0xff] }
 0xdca   : > { %v2023_v61 = vpack.c.bf16 %v4212_v60, %v4212_v60 }
 0xdcc   : > { %2165 = vmatmul.mubr.bf16.vlgmr.msra.gmra.mxu1 %v2023_v61 }
 0xe8c   : > { %v2166_v18 = vpop.f32.mrf.mxu1 }
 0xe8d   : > { %v2167_v19 = vadd.f32 %v2166_v18, %v2045_v14 }
 0xe8e   : > { %v2168_v20 = vpop.f32.mrf.mxu1 }
 0xe8f   : > { %v2173_v17 = vmul.f32 %v2167_v19, %v2167_v19  ;;  %v2169_v21 = vadd.f32 %v2168_v20, %v2049_v15 }
 0xe90   : > { %v2170_v22 = vpop.f32.mrf.mxu1 }
 0xe91   : > { %v2175_v23 = vmul.f32 %v2173_v17, %v2167_v19  ;;  %v2174_v24 = vmul.f32 %v2169_v21, %v2169_v21 }
 0xe92   : > { %v2171_v25 = vpop.f32.mrf.mxu1 }
 0xe93   : > { %v2177_v26 = vmul.f32 0.044715, %v2175_v23  ;;  %v2176_v27 = vmul.f32 %v2174_v24, %v2169_v21 }
 0xe95   : > { %v2179_v13 = vadd.f32 %v2177_v26, %v2167_v19  ;;  %v2178_v28 = vmul.f32 0.044715, %v2176_v27 }
 0xe97   : > { %v2181_v29 = vmul.f32 0.7978846, %v2179_v13  ;;  %v2180_v30 = vadd.f32 %v2178_v28, %v2169_v21 }
 0xe99   : > { %3410 = vtanh.f32 %v2181_v29  ;;  %v2182_v46 = vmul.f32 0.7978846, %v2180_v30 }
 0xe9b   : > { %3412 = vtanh.f32 %v2182_v46 }
 0xea6   : > { %v3411_v43 = vpop.eup %3410 }
 0xea7   : > { %v2185_v44 = vadd.f32 1.0, %v3411_v43 }
 0xea8   : > { %v3413_v31 = vpop.eup %3412 }
 0xea9   : > { %v2186_v32 = vadd.f32 1.0, %v3413_v31  ;;  %v2187_v37 = vmul.f32 0.5, %v2185_v44 }
 0xeab   : > { %v2188_v33 = vmul.f32 0.5, %v2186_v32  ;;  %v2189_v34 = vmul.f32 %v2187_v37, %v2167_v19 }
 0xead   : > { %v2190_v35 = vmul.f32 %v2188_v33, %v2169_v21  ;;  %v2191_v38 = vpack.c.bf16 %v2189_v34, %v2189_v34 }
 0xeaf   : > { %v2192_v36 = vpack.c.bf16 %v2190_v35, %v2190_v35 }
 0xeb1   : > { %2360 = vmatprep.mubr.bf16.mxu0 %v2192_v36 }
 0xeb2   : > { %2361 = vmatmul.mubr.bf16.vlgmr.msra.gmra.mxu0 %v2191_v38 }
 0xf72   : > { %v3036_v39 = vpop.f32.mrf.mxu0 }
 0xf74   : > { %v3037_v41 = vpop.f32.mrf.mxu0 }
 0xf75   : > { %v3038_v42 = vadd.f32 %v3037_v41, %v3036_v39 }
 0xf76   : > { %v3039_v45 = vpop.f32.mrf.mxu0 }
 0xf77   : > { %v2363_v47 = vadd.f32 %v3038_v42, %v2944_v40 }
 0xf78   : > { %v3040_v48 = vpop.f32.mrf.mxu0 }
 0xf79   : > { %v2368_v49 = vadd.f32 %v2363_v47, %v4212_v60  ;;  %v2962_v60 = vld [vmem:[%s904_s8] ss:$0 sm:$0xff] }
 0xf7b   : > { %2371 = vadd.xlane.f32.xlu1 %v2368_v49 }
0x1004   : > { %v2372_v50 = vpop.xlane.xlu1 %2371 }
0x1005   : > { %v2373_v51 = vmul.f32 0.0078125, %v2372_v50 }
0x1007   : > { %v2374_v52 = vsub.f32 %v2368_v49, %v2373_v51 }
0x1009   : > { %v2375_v53 = vmul.f32 %v2374_v52, %v2374_v52 }
0x100b   : > { %2376 = vadd.xlane.f32.xlu1 %v2375_v53 }
0x1094   : > { %v2377_v54 = vpop.xlane.xlu1 %2376 }
0x1095   : > { %v2378_v55 = vmul.f32 0.0078125, %v2377_v54 }
0x1097   : > { %v2379_v56 = vadd.f32 1e-12, %v2378_v55 }
0x1099   : > { %3414 = vrsqrt.f32 %v2379_v56 }
0x10a6   : > { %v3415_v57 = vpop.eup %3414 }
0x10a7   : > { %v2381_v61 = vmul.f32 %v3415_v57, %v2374_v52 }
0x10a9   : > { %v2388_v63 = vmul.f32 %v2961_v59, %v2381_v61  ;;  %2400 = sbr.rel (%p2963_p3) target bundleno = 4713 (0x1269), region = 120 }
0x10ab   : > { %v2395_v0 = vadd.f32 %v2962_v60, %v2388_v63 }
0x10ad   : > { %2396 = vst [vmem:[#allocation2] sm:$0xff] %v2395_v0 }
0x10ae   : > { %v3416_v62 = vld [vmem:[%s4471_s23 + $0x38] sm:$0xff]   ;;  %v3659_v1 = vmov 0.0   ;;  %v3417_v2 = vld [vmem:[%s4472_s18 + $0x30] sm:$0xff]   ;;  %vm3660_vm5 = vmmov 0   ;;  %v3418_v58 = vld [vmem:[%s4472_s18 + $0x28] sm:$0xff]   ;;  %v2401_v10 = vpack.c.bf16 %v2395_v0, %v2395_v0 }
0x10af   : > { %3140 = vmatprep.subr.bf16.mxu0 %v3659_v1  ;;  %3160 = vmatprep.subr.bf16.mxu1 %v3659_v1  ;;  %v3424_v3 = vld [vmem:[%s4473_s2 + $0x38] sm:$0xff]   ;;  %v3419_v4 = vld [vmem:[%s4472_s18 + $0x20] sm:$0xff]   ;;  %v3425_v5 = vld [vmem:[%s4474_s19 + $0x30] sm:$0xff]   ;;  %s4475_s2 = sld [smem:[#allocation44_spill]] }
0x10b0   : > { %3141 = vmatpush3.bf16.msra.mxu0 %v3416_v62  ;;  %3156 = vmatprep.mubr.msk.bf16.mxu0 %vm3660_vm5, %v3659_v1  ;;  %v3420_v6 = vld [vmem:[%s4472_s18 + $0x18] sm:$0xff]   ;;  %v3426_v7 = vld [vmem:[%s4474_s19 + $0x28] sm:$0xff]   ;;  %v3421_v8 = vld [vmem:[%s4472_s18 + $0x10] sm:$0xff]  }
0x10b1   : > { %3142 = vmatprep.subr.bf16.mxu0 %v3659_v1  ;;  %3176 = vmatprep.mubr.msk.bf16.mxu1 %vm3660_vm5, %v3659_v1  ;;  %v3422_v16 = vld [vmem:[%s4472_s18 + $0x8] sm:$0xff]   ;;  %v3423_v9 = vld [vmem:[%s4472_s18] sm:$0xff]   ;;  %v3428_v12 = vld [vmem:[%s4474_s19 + $0x18] sm:$0xff]  }
0x10b2   : > { %3161 = vmatpush3.bf16.msra.mxu1 %v3424_v3  ;;  %v3427_v11 = vld [vmem:[%s4474_s19 + $0x20] sm:$0xff]   ;;  %v3429_v14 = vld [vmem:[%s4474_s19 + $0x10] sm:$0xff]   ;;  %v3430_v15 = vld [vmem:[%s4474_s19 + $0x8] sm:$0xff]  }
0x10b3   : > { %3162 = vmatprep.subr.bf16.mxu1 %v3659_v1  ;;  %v3431_v18 = vld [vmem:[%s4474_s19] sm:$0xff]  }
0x10b4   : > { %3143 = vmatpush3.bf16.msra.mxu0 %v3417_v2  ;;  %v2525_v26 = vld [vmem:[%s4476_s10] sm:$0x1] }
0x10b5   : > { %3144 = vmatprep.subr.bf16.mxu0 %v3659_v1  ;;  %v2418_v19 = vld [vmem:[%s4475_s2] sm:$0x1] }
0x10b6   : > { %3163 = vmatpush3.bf16.msra.mxu1 %v3425_v5 }
0x10b7   : > { %3164 = vmatprep.subr.bf16.mxu1 %v3659_v1 }
0x10b8   : > { %3145 = vmatpush3.bf16.msra.mxu0 %v3418_v58 }
0x10b9   : > { %3146 = vmatprep.subr.bf16.mxu0 %v3659_v1 }
0x10ba   : > { %3165 = vmatpush3.bf16.msra.mxu1 %v3426_v7 }
0x10bb   : > { %3166 = vmatprep.subr.bf16.mxu1 %v3659_v1 }
0x10bc   : > { %3147 = vmatpush3.bf16.msra.mxu0 %v3419_v4 }
0x10bd   : > { %3148 = vmatprep.subr.bf16.mxu0 %v3659_v1 }
0x10be   : > { %3167 = vmatpush3.bf16.msra.mxu1 %v3427_v11 }
0x10bf   : > { %3168 = vmatprep.subr.bf16.mxu1 %v3659_v1 }
0x10c0   : > { %3149 = vmatpush3.bf16.msra.mxu0 %v3420_v6 }
0x10c1   : > { %3150 = vmatprep.subr.bf16.mxu0 %v3659_v1 }
0x10c2   : > { %3169 = vmatpush3.bf16.msra.mxu1 %v3428_v12 }
0x10c3   : > { %3170 = vmatprep.subr.bf16.mxu1 %v3659_v1 }
0x10c4   : > { %3151 = vmatpush3.bf16.msra.mxu0 %v3421_v8 }
0x10c5   : > { %3152 = vmatprep.subr.bf16.mxu0 %v3659_v1 }
0x10c6   : > { %3171 = vmatpush3.bf16.msra.mxu1 %v3429_v14 }
0x10c7   : > { %3172 = vmatprep.subr.bf16.mxu1 %v3659_v1 }
0x10c8   : > { %3153 = vmatpush3.bf16.msra.mxu0 %v3422_v16 }
0x10c9   : > { %3154 = vmatprep.subr.bf16.mxu0 %v3659_v1 }
0x10ca   : > { %3173 = vmatpush3.bf16.msra.mxu1 %v3430_v15 }
0x10cb   : > { %3174 = vmatprep.subr.bf16.mxu1 %v3659_v1 }
0x10cc   : > { %3155 = vmatpush3.bf16.msra.mxu0 %v3423_v9 }
0x10ce   : > { %3175 = vmatpush3.bf16.msra.mxu1 %v3431_v18 }
0x10cf   : > { %3157 = vmatmul.mubr.bf16.vlgmr.msra.gmra.mxu0 %v2401_v10 }
0x118f   : > { %v2501_v20 = vpop.f32.mrf.mxu0 }
0x1190   : > { %v2502_v17 = vadd.f32 %v2501_v20, %v2418_v19 }
0x1191   : > { %v3158_v21 = vpop.f32.mrf.mxu0 }
0x1192   : > { %3432 = vtanh.f32 %v2502_v17 }
0x1193   : > { %v2504_v22 = vpop.f32.mrf.mxu0 }
0x1195   : > { %v3159_v23 = vpop.f32.mrf.mxu0 }
0x119f   : > { %v3433_v24 = vpop.eup %3432 }
0x11a0   : > { %v2508_v25 = vpack.c.bf16 %v3433_v24, %v3433_v24 }
0x11a2   : > { %3177 = vmatmul.mubr.bf16.vlgmr.msra.gmra.mxu1 %v2508_v25 }
0x1262   : > { %v2608_v27 = vpop.f32.mrf.mxu1 }
0x1263   : > { %v2609_v13 = vadd.f32 %v2608_v27, %v2525_v26 }
0x1264   : > { %v3178_v28 = vpop.f32.mrf.mxu1 }
0x1265   : > { %2614 = vst [vmem:[%s4014_s1] sm:$0x1] %v2609_v13 }
0x1266   : > { %v2611_v29 = vpop.f32.mrf.mxu1 }
0x1268   : > { %v3179_v30 = vpop.f32.mrf.mxu1 }
0x1269 PF: > { %s4477_s12 = sld [smem:[#allocation17_spill]]  ;;  %s2628_s20 = sshll.u32 %s4014_s1, 4  ;;  %s2629_s20 = int_to_ptr.vmem [resolvable:$true] %s2628_s20 }
0x126a   : > { %s4479_s7 = sld [smem:[#allocation47_spill]]  ;;  %s4480_s17 = sand.u32 1, %s3606_s22  }
0x126b   : > { %s2616_s21 = scalar_lea.sflag [#allocation5], %s4480_s17  ;;  %s3518_s0 = scalar_lea.vmem %s2629_s20, 16 }
0x126c   : > { %p3519_p0 = scmp.ne.s32.totalorder %s2629_s20, %s3518_s0  ;;  %s3661_s28 = smov [#allocation9]  }
0x126d   : > { %s3522_s15 = sshll.u32 %s3661_s28, 4  ;;  %s3523_s15 = int_to_ptr.vmem [resolvable:$false] %s3522_s15 }
0x126e   : > { %p3520_p1 = pnand %p3519_p0, %p3859_p12  ;;  %s3524_s27 = scalar_lea.vmem %s3523_s15, 32 }
0x126f   : > { %s2980_s26 = sshll.u32 %s4477_s12, 4  ;;  %p3525_p7 = scmp.lt.s32.totalorder %s2629_s20, %s3523_s15 }
0x1270   : > { %s2626_s13 = scalar_lea.hbm %s4479_s7, %s2980_s26  ;;  %p3521_p6 = pneg %p3520_p1 }
0x1271   : > { %p3526_p9 = scmp.lt.s32.totalorder %s3524_s27, %s3518_s0 }
0x1273   : > { %p3527_p10 = por %p3526_p9, %p3525_p7 }
0x1275   : > { %p3528_p11 = pnand %p3527_p10, %p3521_p6 }
0x1277   : > { %3531 = shalt.err (!%p3528_p11)
}
0x1278   : > { %s3532_s25 = scalar_lea.hbm %s2626_s13, 16  ;;  %s3536_s23 = scalar_lea.hbm %s4479_s7, 32 }
0x1279   : > { %p3533_p13 = scmp.ne.s32.totalorder %s2626_s13, %s3532_s25  ;;  %p3537_p8 = scmp.lt.s32.totalorder %s2626_s13, %s4479_s7 }
0x127a   : > { %p3538_p3 = scmp.lt.s32.totalorder %s3536_s23, %s3532_s25 }
0x127b   : > { %p3534_p4 = pnand %p3533_p13, %p3859_p12 }
0x127c   : > { %p3539_p0 = por %p3538_p3, %p3537_p8 }
0x127d   : > { %p3535_p5 = pneg %p3534_p4 }
0x127f   : > { %p3540_p1 = pnand %p3539_p0, %p3535_p5 }
0x1281   : > { %3543 = shalt.err (!%p3540_p1)
}
0x1282   : > { %3190 = dma.vmem_to_hbm [thread:$0]  (%p3859_p12), %s2629_s20, 16, %s2626_s13, %s2616_s21  }
0x1283 PF: > { %s4481_s8 = sld [smem:[#allocation20_spill]] }
0x1284   : > { %s4482_s3 = sld [smem:[#allocation13_spill]] }
0x1289   : > { %p3207_p6 = scmp.ge.s32.totalorder %s4481_s8, 2 }
0x128a   : > { %s2640_s11 = sand.u32 1, %s4482_s3  }
0x128b   : > { %p3203_p7 = pnand %p3207_p6, %p3869_p2  ;;  %s2641_s2 = scalar_lea.sflag [#allocation5], %s2640_s11 }
0x128d   : > { %p3204_p9 = pneg %p3203_p7 }
0x128f   : > { %3597 = dma.done.wait (%p3204_p9), %s2641_s2, 16  }
0x1290   : > { %3599 = vsyncadd (%p3204_p9), %s2641_s2, 4294967280  ;;  %s39_s4 = sadd.s32 1, %s4481_s8   ;;  %s4484_s9 = sld [smem:[#allocation14_spill]] }
0x1291   : > { %p36_p10 = scmp.ge.s32.totalorder %s39_s4, 6   ;;  %s4485_s23 = sld [smem:[#allocation24_spill]] }
0x1292   : > { %s4486_s24 = sld [smem:[#allocation15_spill]]  ;;  %s4493_s1 = smov %s3606_s22 }
0x1293   : > { %s4487_s2 = sld [smem:[#allocation16_spill]] }
0x1294   : > { %s4488_s25 = sld [smem:[#allocation23_spill]]  ;;  %38 = sbr.rel (!%p36_p10) target bundleno = 33 (0x21), region = 210 }
0x1295   : > { %s4489_s3 = sld [smem:[#allocation18_spill]] }
0x1296   : > { %s4490_s26 = sld [smem:[#allocation19_spill]]  ;;  %s4494_s22 = smov %s4484_s9 }
0x1297   : > { %s4491_s27 = sld [smem:[#allocation21_spill]] }
0x1298   : > { %s4492_s28 = sld [smem:[#allocation22_spill]] }
0x1299   :  { %2645 = vsyncpa [#allocation4], 1 }
0x129a   :  { %2647 = vsyncpa [#allocation4 + $0x1], 1 }
0x129b   :  { %2648 = vsyncpa [#allocation7], 1 }
0x129c   :  { %2650 = vsyncpa [#allocation7 + $0x1], 1 }
0x129d   :  { %2651 = vsyncpa [#allocation5], 1 }
0x129e   :  { %2653 = vsyncpa [#allocation5 + $0x1], 1 }

</bundles_post_ra>
